<compile_context>
chip_gen: v5e
topology: v5e:2x2
jax: 0.10.0
libtpu: 0.0.40
codegen_flags: <defaults>
</compile_context>

<pallas_src>
import numpy as np
import jax
import jax.numpy as jnp
from jax.experimental import pallas as pl
from jax.experimental.pallas import tpu as pltpu


# ----------------------------------------------------------------------------
# 1-D bilinear interpolation matrix (PyTorch F.interpolate, align_corners=False)
# ----------------------------------------------------------------------------
def _bilinear_matrix(out_size, in_size):
    """Row-stochastic (out_size, in_size) 1-D bilinear interpolation matrix."""
    if in_size == out_size:
        return np.eye(out_size, dtype=np.float64)
    scale = in_size / out_size
    dst = np.arange(out_size, dtype=np.float64)
    src = np.clip((dst + 0.5) * scale - 0.5, 0.0, None)   # half-pixel centers
    i0 = np.minimum(np.floor(src).astype(np.int64), in_size - 1)
    i1 = np.minimum(i0 + 1, in_size - 1)
    lam = src - i0
    W = np.zeros((out_size, in_size), dtype=np.float64)
    np.add.at(W, (np.arange(out_size), i0), 1.0 - lam)
    np.add.at(W, (np.arange(out_size), i1), lam)
    return W


def _pick_row_tile(h2, w2):
    """Output image rows per grid step.

    Must be a multiple of 8 (sublane rule for the row-sliced (TH, H3) interp
    block) or the full H2.  Targets <=4096 slab rows per tile and >=2 tiles so
    each TensorCore gets real pipeline depth.
    """
    cands = [th for th in range(8, h2, 8) if h2 % th == 0 and th * w2 <= 4096]
    return max(cands) if cands else h2


# ----------------------------------------------------------------------------
# Parameters (arch='resnet18': mfactor=1, out_dim=128), PyTorch conv layout.
# ----------------------------------------------------------------------------
def init_fpn_params(key, mfactor=1, out_dim=128):
    cins = {
        "layer1": 512 * mfactor,        # consumes res5
        "layer2": 512 * mfactor // 2,   # consumes res4
        "layer3": 512 * mfactor // 4,   # consumes res3
        "layer4": 512 * mfactor // 8,   # consumes res2
    }
    params = {}
    for name, cin in cins.items():
        key, kw, kb = jax.random.split(key, 3)
        params[name + "_w"] = (
            jax.random.normal(kw, (out_dim, cin, 1, 1), jnp.float32) * 0.05
        )
        params[name + "_b"] = jax.random.normal(kb, (out_dim,), jnp.float32) * 0.05
    return params


# ----------------------------------------------------------------------------
# Fused decoder (channels-last).  feats are (B, H, W, C); returns (B, H2, W2, Co)
# ----------------------------------------------------------------------------
def fpn_decoder_forward_nhwc(params, feats_nhwc):
    x5n, x4n = feats_nhwc["res5"], feats_nhwc["res4"]
    x3n, x2n = feats_nhwc["res3"], feats_nhwc["res2"]
    B, H5, W5, C5 = x5n.shape
    _, H4, W4, C4 = x4n.shape
    _, H3, W3, C3 = x3n.shape
    _, H2, W2, C2 = x2n.shape
    Cout = params["layer1_w"].shape[0]
    f32, bf16 = jnp.float32, jnp.bfloat16

    # -------- MXU operands in bf16 (halves DMA bytes); accumulate in f32 ------
    def slab(x):                      # (B,H,W,C) -> (B, H*W, C)  (free reshape)
        b, h, w, c = x.shape
        return x.reshape(b, h * w, c).astype(bf16)

    x5, x4, x3, x2 = slab(x5n), slab(x4n), slab(x3n), slab(x2n)

    def wmat(name):                   # (Cout,Cin,1,1) -> (Cin, Cout), bf16
        w = params[name + "_w"]
        return w.reshape(w.shape[0], w.shape[1]).T.astype(bf16)

    def bvec(name):                   # f32 bias, added in f32 on the VPU
        return params[name + "_b"].reshape(1, Cout).astype(f32)

    w1, b1 = wmat("layer1"), bvec("layer1")
    w2, b2 = wmat("layer2"), bvec("layer2")
    w3, b3 = wmat("layer3"), bvec("layer3")
    w4, b4 = wmat("layer4"), bvec("layer4")

    # Separable bilinear: one (Hout,Hin) and one (Wout,Win) matrix per level.
    def interp(n_out, n_in):
        return jnp.asarray(_bilinear_matrix(n_out, n_in), bf16)

    wh54, ww54 = interp(H4, H5), interp(W4, W5)
    wh43, ww43 = interp(H3, H4), interp(W3, W4)
    wh32, ww32 = interp(H2, H3), interp(W2, W3)

    TH = _pick_row_tile(H2, W2)       # output image rows per grid step
    n_tiles = H2 // TH

    # ----------------------------- kernel -------------------------------------
    def conv1x1(x2d, w, b, h, wdt):
        # x2d: (h*wdt, Cin) bf16, w: (Cin, Cout) bf16, b: (1, Cout) f32
        y = jnp.dot(x2d, w, preferred_element_type=f32) + b
        return y.reshape(h, wdt, Cout)                       # (h, wdt, Cout) f32

    def upsample(o3d, wh, ww, wout):
        # o3d: (hin, win, Cout) f32 ; wh: (hout, hin) bf16 ; ww: (wout, win) bf16
        hin, win, _ = o3d.shape
        hout = wh.shape[0]
        # H-interp: lane-dense 2-D matmul on the (hin, win*C) slab.
        a = jnp.dot(wh, o3d.astype(bf16).reshape(hin, win * Cout),
                    preferred_element_type=f32)              # (hout, win*C)
        a = a.astype(bf16).reshape(hout, win, Cout)
        # W-interp: batched matmul over output rows.
        wwb = jnp.broadcast_to(ww, (hout, wout, win))
        return jnp.einsum("how,hwc->hoc", wwb, a,
                          preferred_element_type=f32)        # (hout, wout, Cout)

    def kernel(x5_ref, x4_ref, x3_ref, x2_ref,
               w1_ref, b1_ref, w2_ref, b2_ref,
               w3_ref, b3_ref, w4_ref, b4_ref,
               wh54_ref, ww54_ref, wh43_ref, ww43_ref,
               wh32_ref, ww32_ref,
               o_ref, o3_scr):
        t = pl.program_id(1)

        # Coarse chain once per batch element; cache o3 as the bf16 (H3, W3*C)
        # slab the per-tile H-interp matmul consumes directly.
        @pl.when(t == 0)
        def _():
            o1 = conv1x1(x5_ref[...], w1_ref[...], b1_ref[...], H5, W5)
            o2 = (upsample(o1, wh54_ref[...], ww54_ref[...], W4)
                  + conv1x1(x4_ref[...], w2_ref[...], b2_ref[...], H4, W4))
            o3 = (upsample(o2, wh43_ref[...], ww43_ref[...], W3)
                  + conv1x1(x3_ref[...], w3_ref[...], b3_ref[...], H3, W3))
            o3_scr[...] = o3.astype(bf16).reshape(H3, W3 * Cout)

        # Finest level: TH output image rows per grid step.
        a = jnp.dot(wh32_ref[...], o3_scr[...],
                    preferred_element_type=f32)              # (TH, W3*Cout)
        a = a.astype(bf16).reshape(TH, W3, Cout)
        wwb = jnp.broadcast_to(ww32_ref[...], (TH, W2, W3))
        up = jnp.einsum("how,hwc->hoc", wwb, a,
                        preferred_element_type=f32)          # (TH, W2, Cout)
        o4 = up + conv1x1(x2_ref[...], w4_ref[...], b4_ref[...], TH, W2)
        o_ref[...] = o4.astype(o_ref.dtype)

    # ------------------------------ specs --------------------------------------
    def whole(shape):
        nd = len(shape)
        return pl.BlockSpec(shape, lambda b, t: (0,) * nd)

    in_specs = [
        pl.BlockSpec((None, H5 * W5, C5), lambda b, t: (b, 0, 0)),
        pl.BlockSpec((None, H4 * W4, C4), lambda b, t: (b, 0, 0)),
        pl.BlockSpec((None, H3 * W3, C3), lambda b, t: (b, 0, 0)),
        pl.BlockSpec((None, TH * W2, C2), lambda b, t: (b, t, 0)),   # row-tiled
        whole(w1.shape), whole(b1.shape),
        whole(w2.shape), whole(b2.shape),
        whole(w3.shape), whole(b3.shape),
        whole(w4.shape), whole(b4.shape),
        whole(wh54.shape), whole(ww54.shape),
        whole(wh43.shape), whole(ww43.shape),
        pl.BlockSpec((TH, H3), lambda b, t: (t, 0)),                 # row-sliced
        whole(ww32.shape),
    ]
    out_spec = pl.BlockSpec((None, TH, W2, Cout), lambda b, t: (b, t, 0, 0))

    # Explicit VMEM budget: double-buffered blocks + scratch, with headroom.
    est = 2 * (
        2 * (H5 * W5 * C5 + H4 * W4 * C4 + H3 * W3 * C3 + TH * W2 * C2)   # x, bf16
        + 2 * (C5 + C4 + C3 + C2) * Cout + 4 * 4 * Cout                   # w, b
        + 2 * (H4 * H5 + W4 * W5 + H3 * H4 + W3 * W4 + TH * H3 + W2 * W3)  # interp
        + 4 * TH * W2 * Cout                                               # out tile
    ) + 2 * H3 * W3 * Cout                                                 # scratch
    vmem_limit = int(min(64 * 2**20, max(16 * 2**20, 4 * est)))

    out = pl.pallas_call(
        kernel,
        out_shape=jax.ShapeDtypeStruct((B, H2, W2, Cout), f32),
        grid=(B, n_tiles),
        in_specs=in_specs,
        out_specs=out_spec,
        scratch_shapes=[pltpu.VMEM((H3, W3 * Cout), bf16)],
        compiler_params=pltpu.CompilerParams(
            dimension_semantics=("parallel", "arbitrary"),   # batch // cores
            vmem_limit_bytes=vmem_limit,
        ),
    )(x5, x4, x3, x2, w1, b1, w2, b2, w3, b3, w4, b4,
      wh54, ww54, wh43, ww43, wh32, ww32)
    return out                                               # (B, H2, W2, Cout)


def fpn_decoder_forward(params, feats_nchw):
    """NCHW wrapper for parity with the PyTorch module (one transpose in/out)."""
    nhwc = {k: jnp.transpose(v, (0, 2, 3, 1)) for k, v in feats_nchw.items()}
    out = fpn_decoder_forward_nhwc(params, nhwc)
    return jnp.transpose(out, (0, 3, 1, 2))


# ----------------------------------------------------------------------------
# Pure-JAX f32 reference (correctness smoke test)
# ----------------------------------------------------------------------------
def _ref_forward(params, feats):
    def conv(x, w, b):
        w2 = w.reshape(w.shape[0], w.shape[1])
        return (jnp.einsum("bchw,oc->bohw", x, w2, precision="highest")
                + b[None, :, None, None])

    def up_add(x, y):
        _, _, Hin, Win = x.shape
        _, _, Hout, Wout = y.shape
        wh = jnp.asarray(_bilinear_matrix(Hout, Hin), jnp.float32)
        ww = jnp.asarray(_bilinear_matrix(Wout, Win), jnp.float32)
        return jnp.einsum("oh,bchw,pw->bcop", wh, x, ww, precision="highest") + y

    o1 = conv(feats["res5"], params["layer1_w"], params["layer1_b"])
    o2 = up_add(o1, conv(feats["res4"], params["layer2_w"], params["layer2_b"]))
    o3 = up_add(o2, conv(feats["res3"], params["layer3_w"], params["layer3_b"]))
    o4 = up_add(o3, conv(feats["res2"], params["layer4_w"], params["layer4_b"]))
    return o4


if __name__ == "__main__":
    key = jax.random.PRNGKey(0)
    k_par, k2, k3, k4, k5 = jax.random.split(key, 5)

    B = 2
    feats = {
        "res2": jax.random.normal(k2, (B, 64, 16, 16), jnp.float32),
        "res3": jax.random.normal(k3, (B, 128, 8, 8), jnp.float32),
        "res4": jax.random.normal(k4, (B, 256, 4, 4), jnp.float32),
        "res5": jax.random.normal(k5, (B, 512, 2, 2), jnp.float32),
    }
    params = init_fpn_params(k_par)

    out = jax.block_until_ready(fpn_decoder_forward(params, feats))
    assert out.shape == (B, 128, 16, 16), out.shape

    ref = jax.block_until_ready(_ref_forward(params, feats))
    # Kernel feeds the MXU bf16 operands (f32 accumulation); reference is full
    # f32, so compare at a bf16-appropriate tolerance.
    np.testing.assert_allclose(np.asarray(out), np.asarray(ref),
                               rtol=5e-2, atol=5e-2)
    print("KERNEL_OK")
</pallas_src>

<mosaic_0001>
module attributes {stable_mosaic.version = 11 : i64} {
  func.func @kernel(%arg0: i32, %arg1: i32, %arg2: memref<1x4x512xbf16, #tpu.memory_space<vmem>>, %arg3: memref<1x16x256xbf16, #tpu.memory_space<vmem>>, %arg4: memref<1x64x128xbf16, #tpu.memory_space<vmem>>, %arg5: memref<1x128x64xbf16, #tpu.memory_space<vmem>>, %arg6: memref<512x128xbf16, #tpu.memory_space<vmem>>, %arg7: memref<1x128xf32, #tpu.memory_space<vmem>>, %arg8: memref<256x128xbf16, #tpu.memory_space<vmem>>, %arg9: memref<1x128xf32, #tpu.memory_space<vmem>>, %arg10: memref<128x128xbf16, #tpu.memory_space<vmem>>, %arg11: memref<1x128xf32, #tpu.memory_space<vmem>>, %arg12: memref<64x128xbf16, #tpu.memory_space<vmem>>, %arg13: memref<1x128xf32, #tpu.memory_space<vmem>>, %arg14: memref<4x2xbf16, #tpu.memory_space<vmem>>, %arg15: memref<4x2xbf16, #tpu.memory_space<vmem>>, %arg16: memref<8x4xbf16, #tpu.memory_space<vmem>>, %arg17: memref<8x4xbf16, #tpu.memory_space<vmem>>, %arg18: memref<8x8xbf16, #tpu.memory_space<vmem>>, %arg19: memref<16x8xbf16, #tpu.memory_space<vmem>>, %arg20: memref<1x8x16x128xf32, #tpu.memory_space<vmem>>, %arg21: memref<8x1024xbf16, #tpu.memory_space<vmem>>) attributes {dimension_semantics = [#tpu.dimension_semantics<parallel>, #tpu.dimension_semantics<arbitrary>], iteration_bounds = array<i64: 2, 2>, scalar_prefetch = 0 : i64, scratch_operands = 1 : i64, tpu.core_type = #tpu.core_type<tc>, window_params = [{transform_indices = @transform_0, window_bounds = array<i64: 1, 4, 512>}, {transform_indices = @transform_1, window_bounds = array<i64: 1, 16, 256>}, {transform_indices = @transform_2, window_bounds = array<i64: 1, 64, 128>}, {transform_indices = @transform_3, window_bounds = array<i64: 1, 128, 64>}, {pipeline_mode = #tpu.pipeline_mode<synchronous>, transform_indices = @transform_4, window_bounds = array<i64: 512, 128>}, {pipeline_mode = #tpu.pipeline_mode<synchronous>, transform_indices = @transform_5, window_bounds = array<i64: 1, 128>}, {pipeline_mode = #tpu.pipeline_mode<synchronous>, transform_indices = @transform_6, window_bounds = array<i64: 256, 128>}, {pipeline_mode = #tpu.pipeline_mode<synchronous>, transform_indices = @transform_7, window_bounds = array<i64: 1, 128>}, {pipeline_mode = #tpu.pipeline_mode<synchronous>, transform_indices = @transform_8, window_bounds = array<i64: 128, 128>}, {pipeline_mode = #tpu.pipeline_mode<synchronous>, transform_indices = @transform_9, window_bounds = array<i64: 1, 128>}, {pipeline_mode = #tpu.pipeline_mode<synchronous>, transform_indices = @transform_10, window_bounds = array<i64: 64, 128>}, {pipeline_mode = #tpu.pipeline_mode<synchronous>, transform_indices = @transform_11, window_bounds = array<i64: 1, 128>}, {pipeline_mode = #tpu.pipeline_mode<synchronous>, transform_indices = @transform_12, window_bounds = array<i64: 4, 2>}, {pipeline_mode = #tpu.pipeline_mode<synchronous>, transform_indices = @transform_13, window_bounds = array<i64: 4, 2>}, {pipeline_mode = #tpu.pipeline_mode<synchronous>, transform_indices = @transform_14, window_bounds = array<i64: 8, 4>}, {pipeline_mode = #tpu.pipeline_mode<synchronous>, transform_indices = @transform_15, window_bounds = array<i64: 8, 4>}, {transform_indices = @transform_16, window_bounds = array<i64: 8, 8>}, {pipeline_mode = #tpu.pipeline_mode<synchronous>, transform_indices = @transform_17, window_bounds = array<i64: 16, 8>}, {transform_indices = @transform_18, window_bounds = array<i64: 1, 8, 16, 128>}]} {
    %c0_i32 = arith.constant 0 : i32
    %0 = arith.cmpi eq, %arg1, %c0_i32 : i32
    %1 = arith.extui %0 : i1 to i32
    %c0_i32_0 = arith.constant 0 : i32
    %2 = arith.cmpi ne, %1, %c0_i32_0 : i32
    scf.if %2 {
      %c0_19 = arith.constant 0 : index
      %c0_20 = arith.constant 0 : index
      %c0_21 = arith.constant 0 : index
      %24 = vector.load %arg2[%c0_19, %c0_20, %c0_21] : memref<1x4x512xbf16, #tpu.memory_space<vmem>>, vector<1x4x512xbf16>
      %25 = vector.shape_cast %24 : vector<1x4x512xbf16> to vector<4x512xbf16>
      %c0_22 = arith.constant 0 : index
      %c0_23 = arith.constant 0 : index
      %26 = vector.load %arg6[%c0_22, %c0_23] : memref<512x128xbf16, #tpu.memory_space<vmem>>, vector<512x128xbf16>
      %c0_24 = arith.constant 0 : index
      %c0_25 = arith.constant 0 : index
      %27 = vector.load %arg7[%c0_24, %c0_25] : memref<1x128xf32, #tpu.memory_space<vmem>>, vector<1x128xf32>
      %cst_26 = arith.constant dense<0.000000e+00> : vector<4x128xf32>
      %28 = tpu.matmul %25, %26, %cst_26 {dimension_numbers = #tpu.dot_dimension_numbers<[1], [0], [0], [1], [0, 0, 1, 1], [], []>} : vector<4x512xbf16>, vector<512x128xbf16>, vector<4x128xf32> -> vector<4x128xf32>
      %29 = vector.broadcast %27 : vector<1x128xf32> to vector<4x128xf32>
      %30 = arith.addf %28, %29 : vector<4x128xf32>
      %31 = vector.shape_cast %30 : vector<4x128xf32> to vector<2x2x128xf32>
      %c0_27 = arith.constant 0 : index
      %c0_28 = arith.constant 0 : index
      %32 = vector.load %arg14[%c0_27, %c0_28] : memref<4x2xbf16, #tpu.memory_space<vmem>>, vector<4x2xbf16>
      %c0_29 = arith.constant 0 : index
      %c0_30 = arith.constant 0 : index
      %33 = vector.load %arg15[%c0_29, %c0_30] : memref<4x2xbf16, #tpu.memory_space<vmem>>, vector<4x2xbf16>
      %34 = arith.truncf %31 : vector<2x2x128xf32> to vector<2x2x128xbf16>
      %35 = vector.shape_cast %34 : vector<2x2x128xbf16> to vector<2x256xbf16>
      %cst_31 = arith.constant dense<0.000000e+00> : vector<4x256xf32>
      %36 = tpu.matmul %32, %35, %cst_31 {dimension_numbers = #tpu.dot_dimension_numbers<[1], [0], [0], [1], [0, 0, 1, 1], [], []>} : vector<4x2xbf16>, vector<2x256xbf16>, vector<4x256xf32> -> vector<4x256xf32>
      %37 = arith.truncf %36 : vector<4x256xf32> to vector<4x256xbf16>
      %38 = vector.shape_cast %37 : vector<4x256xbf16> to vector<4x2x128xbf16>
      %39 = vector.shape_cast %33 : vector<4x2xbf16> to vector<1x4x2xbf16>
      %40 = vector.broadcast %39 : vector<1x4x2xbf16> to vector<4x4x2xbf16>
      "tpu.trace_start"() <{level = 10 : i32, message = "how,hwc->hoc"}> : () -> ()
      %cst_32 = arith.constant dense<0.000000e+00> : vector<4x4x128xf32>
      %41 = tpu.matmul %40, %38, %cst_32 {dimension_numbers = #tpu.dot_dimension_numbers<[2], [1], [1], [2], [0, 0, 0, 1, 1, 2], [0], [0]>} : vector<4x4x2xbf16>, vector<4x2x128xbf16>, vector<4x4x128xf32> -> vector<4x4x128xf32>
      "tpu.trace_stop"() : () -> ()
      %c0_33 = arith.constant 0 : index
      %c0_34 = arith.constant 0 : index
      %c0_35 = arith.constant 0 : index
      %42 = vector.load %arg3[%c0_33, %c0_34, %c0_35] : memref<1x16x256xbf16, #tpu.memory_space<vmem>>, vector<1x16x256xbf16>
      %43 = vector.shape_cast %42 : vector<1x16x256xbf16> to vector<16x256xbf16>
      %c0_36 = arith.constant 0 : index
      %c0_37 = arith.constant 0 : index
      %44 = vector.load %arg8[%c0_36, %c0_37] : memref<256x128xbf16, #tpu.memory_space<vmem>>, vector<256x128xbf16>
      %c0_38 = arith.constant 0 : index
      %c0_39 = arith.constant 0 : index
      %45 = vector.load %arg9[%c0_38, %c0_39] : memref<1x128xf32, #tpu.memory_space<vmem>>, vector<1x128xf32>
      %cst_40 = arith.constant dense<0.000000e+00> : vector<16x128xf32>
      %46 = tpu.matmul %43, %44, %cst_40 {dimension_numbers = #tpu.dot_dimension_numbers<[1], [0], [0], [1], [0, 0, 1, 1], [], []>} : vector<16x256xbf16>, vector<256x128xbf16>, vector<16x128xf32> -> vector<16x128xf32>
      %47 = vector.broadcast %45 : vector<1x128xf32> to vector<16x128xf32>
      %48 = arith.addf %46, %47 : vector<16x128xf32>
      %49 = vector.shape_cast %48 : vector<16x128xf32> to vector<4x4x128xf32>
      %50 = arith.addf %41, %49 : vector<4x4x128xf32>
      %c0_41 = arith.constant 0 : index
      %c0_42 = arith.constant 0 : index
      %51 = vector.load %arg16[%c0_41, %c0_42] : memref<8x4xbf16, #tpu.memory_space<vmem>>, vector<8x4xbf16>
      %c0_43 = arith.constant 0 : index
      %c0_44 = arith.constant 0 : index
      %52 = vector.load %arg17[%c0_43, %c0_44] : memref<8x4xbf16, #tpu.memory_space<vmem>>, vector<8x4xbf16>
      %53 = arith.truncf %50 : vector<4x4x128xf32> to vector<4x4x128xbf16>
      %54 = vector.shape_cast %53 : vector<4x4x128xbf16> to vector<4x512xbf16>
      %cst_45 = arith.constant dense<0.000000e+00> : vector<8x512xf32>
      %55 = tpu.matmul %51, %54, %cst_45 {dimension_numbers = #tpu.dot_dimension_numbers<[1], [0], [0], [1], [0, 0, 1, 1], [], []>} : vector<8x4xbf16>, vector<4x512xbf16>, vector<8x512xf32> -> vector<8x512xf32>
      %56 = arith.truncf %55 : vector<8x512xf32> to vector<8x512xbf16>
      %57 = vector.shape_cast %56 : vector<8x512xbf16> to vector<8x4x128xbf16>
      %58 = vector.shape_cast %52 : vector<8x4xbf16> to vector<1x8x4xbf16>
      %59 = vector.broadcast %58 : vector<1x8x4xbf16> to vector<8x8x4xbf16>
      "tpu.trace_start"() <{level = 10 : i32, message = "how,hwc->hoc"}> : () -> ()
      %cst_46 = arith.constant dense<0.000000e+00> : vector<8x8x128xf32>
      %60 = tpu.matmul %59, %57, %cst_46 {dimension_numbers = #tpu.dot_dimension_numbers<[2], [1], [1], [2], [0, 0, 0, 1, 1, 2], [0], [0]>} : vector<8x8x4xbf16>, vector<8x4x128xbf16>, vector<8x8x128xf32> -> vector<8x8x128xf32>
      "tpu.trace_stop"() : () -> ()
      %c0_47 = arith.constant 0 : index
      %c0_48 = arith.constant 0 : index
      %c0_49 = arith.constant 0 : index
      %61 = vector.load %arg4[%c0_47, %c0_48, %c0_49] : memref<1x64x128xbf16, #tpu.memory_space<vmem>>, vector<1x64x128xbf16>
      %62 = vector.shape_cast %61 : vector<1x64x128xbf16> to vector<64x128xbf16>
      %c0_50 = arith.constant 0 : index
      %c0_51 = arith.constant 0 : index
      %63 = vector.load %arg10[%c0_50, %c0_51] : memref<128x128xbf16, #tpu.memory_space<vmem>>, vector<128x128xbf16>
      %c0_52 = arith.constant 0 : index
      %c0_53 = arith.constant 0 : index
      %64 = vector.load %arg11[%c0_52, %c0_53] : memref<1x128xf32, #tpu.memory_space<vmem>>, vector<1x128xf32>
      %cst_54 = arith.constant dense<0.000000e+00> : vector<64x128xf32>
      %65 = tpu.matmul %62, %63, %cst_54 {dimension_numbers = #tpu.dot_dimension_numbers<[1], [0], [0], [1], [0, 0, 1, 1], [], []>} : vector<64x128xbf16>, vector<128x128xbf16>, vector<64x128xf32> -> vector<64x128xf32>
      %66 = vector.broadcast %64 : vector<1x128xf32> to vector<64x128xf32>
      %67 = arith.addf %65, %66 : vector<64x128xf32>
      %68 = vector.shape_cast %67 : vector<64x128xf32> to vector<8x8x128xf32>
      %69 = arith.addf %60, %68 : vector<8x8x128xf32>
      %70 = arith.truncf %69 : vector<8x8x128xf32> to vector<8x8x128xbf16>
      %71 = vector.shape_cast %70 : vector<8x8x128xbf16> to vector<8x1024xbf16>
      %c0_55 = arith.constant 0 : index
      %c0_56 = arith.constant 0 : index
      %72 = vector.load %arg21[%c0_55, %c0_56] : memref<8x1024xbf16, #tpu.memory_space<vmem>>, vector<8x1024xbf16>
      tpu.vector_store %arg21[%c0_55, %c0_56], %71 {strides = array<i32>} : memref<8x1024xbf16, #tpu.memory_space<vmem>>, vector<8x1024xbf16>,
    } else {
    }
    %c0 = arith.constant 0 : index
    %c0_1 = arith.constant 0 : index
    %3 = vector.load %arg18[%c0, %c0_1] : memref<8x8xbf16, #tpu.memory_space<vmem>>, vector<8x8xbf16>
    %c0_2 = arith.constant 0 : index
    %c0_3 = arith.constant 0 : index
    %4 = vector.load %arg21[%c0_2, %c0_3] : memref<8x1024xbf16, #tpu.memory_space<vmem>>, vector<8x1024xbf16>
    %cst = arith.constant dense<0.000000e+00> : vector<8x1024xf32>
    %5 = tpu.matmul %3, %4, %cst {dimension_numbers = #tpu.dot_dimension_numbers<[1], [0], [0], [1], [0, 0, 1, 1], [], []>} : vector<8x8xbf16>, vector<8x1024xbf16>, vector<8x1024xf32> -> vector<8x1024xf32>
    %6 = arith.truncf %5 : vector<8x1024xf32> to vector<8x1024xbf16>
    %7 = vector.shape_cast %6 : vector<8x1024xbf16> to vector<8x8x128xbf16>
    %c0_4 = arith.constant 0 : index
    %c0_5 = arith.constant 0 : index
    %8 = vector.load %arg19[%c0_4, %c0_5] : memref<16x8xbf16, #tpu.memory_space<vmem>>, vector<16x8xbf16>
    %9 = vector.shape_cast %8 : vector<16x8xbf16> to vector<1x16x8xbf16>
    %10 = vector.broadcast %9 : vector<1x16x8xbf16> to vector<8x16x8xbf16>
    "tpu.trace_start"() <{level = 10 : i32, message = "how,hwc->hoc"}> : () -> ()
    %cst_6 = arith.constant dense<0.000000e+00> : vector<8x16x128xf32>
    %11 = tpu.matmul %10, %7, %cst_6 {dimension_numbers = #tpu.dot_dimension_numbers<[2], [1], [1], [2], [0, 0, 0, 1, 1, 2], [0], [0]>} : vector<8x16x8xbf16>, vector<8x8x128xbf16>, vector<8x16x128xf32> -> vector<8x16x128xf32>
    "tpu.trace_stop"() : () -> ()
    %c0_7 = arith.constant 0 : index
    %c0_8 = arith.constant 0 : index
    %c0_9 = arith.constant 0 : index
    %12 = vector.load %arg5[%c0_7, %c0_8, %c0_9] : memref<1x128x64xbf16, #tpu.memory_space<vmem>>, vector<1x128x64xbf16>
    %13 = vector.shape_cast %12 : vector<1x128x64xbf16> to vector<128x64xbf16>
    %c0_10 = arith.constant 0 : index
    %c0_11 = arith.constant 0 : index
    %14 = vector.load %arg12[%c0_10, %c0_11] : memref<64x128xbf16, #tpu.memory_space<vmem>>, vector<64x128xbf16>
    %c0_12 = arith.constant 0 : index
    %c0_13 = arith.constant 0 : index
    %15 = vector.load %arg13[%c0_12, %c0_13] : memref<1x128xf32, #tpu.memory_space<vmem>>, vector<1x128xf32>
    %cst_14 = arith.constant dense<0.000000e+00> : vector<128x128xf32>
    %16 = tpu.matmul %13, %14, %cst_14 {dimension_numbers = #tpu.dot_dimension_numbers<[1], [0], [0], [1], [0, 0, 1, 1], [], []>} : vector<128x64xbf16>, vector<64x128xbf16>, vector<128x128xf32> -> vector<128x128xf32>
    %17 = vector.broadcast %15 : vector<1x128xf32> to vector<128x128xf32>
    %18 = arith.addf %16, %17 : vector<128x128xf32>
    %19 = vector.shape_cast %18 : vector<128x128xf32> to vector<8x16x128xf32>
    %20 = arith.addf %11, %19 : vector<8x16x128xf32>
    %c0_15 = arith.constant 0 : index
    %c0_16 = arith.constant 0 : index
    %c0_17 = arith.constant 0 : index
    %c0_18 = arith.constant 0 : index
    %21 = vector.load %arg20[%c0_15, %c0_16, %c0_17, %c0_18] : memref<1x8x16x128xf32, #tpu.memory_space<vmem>>, vector<1x8x16x128xf32>
    %22 = vector.shape_cast %21 : vector<1x8x16x128xf32> to vector<8x16x128xf32>
    %23 = vector.shape_cast %20 : vector<8x16x128xf32> to vector<1x8x16x128xf32>
    tpu.vector_store %arg20[%c0_15, %c0_16, %c0_17, %c0_18], %23 {strides = array<i32>} : memref<1x8x16x128xf32, #tpu.memory_space<vmem>>, vector<1x8x16x128xf32>,
    return
  }
  func.func @transform_0(%arg0: i32, %arg1: i32) -> (i32, i32, i32) {
    %c0_i32 = arith.constant 0 : i32
    %c0_i32_0 = arith.constant 0 : i32
    %c0_i32_1 = arith.constant 0 : i32
    return %arg0, %c0_i32, %c0_i32_0 : i32, i32, i32
  }
  func.func @transform_1(%arg0: i32, %arg1: i32) -> (i32, i32, i32) {
    %c0_i32 = arith.constant 0 : i32
    %c0_i32_0 = arith.constant 0 : i32
    %c0_i32_1 = arith.constant 0 : i32
    return %arg0, %c0_i32, %c0_i32_0 : i32, i32, i32
  }
  func.func @transform_2(%arg0: i32, %arg1: i32) -> (i32, i32, i32) {
    %c0_i32 = arith.constant 0 : i32
    %c0_i32_0 = arith.constant 0 : i32
    %c0_i32_1 = arith.constant 0 : i32
    return %arg0, %c0_i32, %c0_i32_0 : i32, i32, i32
  }
  func.func @transform_3(%arg0: i32, %arg1: i32) -> (i32, i32, i32) {
    %c0_i32 = arith.constant 0 : i32
    %c0_i32_0 = arith.constant 0 : i32
    return %arg0, %arg1, %c0_i32 : i32, i32, i32
  }
  func.func @transform_4(%arg0: i32, %arg1: i32) -> (i32, i32) {
    %c0_i32 = arith.constant 0 : i32
    %c0_i32_0 = arith.constant 0 : i32
    %c0_i32_1 = arith.constant 0 : i32
    return %c0_i32, %c0_i32_0 : i32, i32
  }
  func.func @transform_5(%arg0: i32, %arg1: i32) -> (i32, i32) {
    %c0_i32 = arith.constant 0 : i32
    %c0_i32_0 = arith.constant 0 : i32
    %c0_i32_1 = arith.constant 0 : i32
    return %c0_i32, %c0_i32_0 : i32, i32
  }
  func.func @transform_6(%arg0: i32, %arg1: i32) -> (i32, i32) {
    %c0_i32 = arith.constant 0 : i32
    %c0_i32_0 = arith.constant 0 : i32
    %c0_i32_1 = arith.constant 0 : i32
    return %c0_i32, %c0_i32_0 : i32, i32
  }
  func.func @transform_7(%arg0: i32, %arg1: i32) -> (i32, i32) {
    %c0_i32 = arith.constant 0 : i32
    %c0_i32_0 = arith.constant 0 : i32
    %c0_i32_1 = arith.constant 0 : i32
    return %c0_i32, %c0_i32_0 : i32, i32
  }
  func.func @transform_8(%arg0: i32, %arg1: i32) -> (i32, i32) {
    %c0_i32 = arith.constant 0 : i32
    %c0_i32_0 = arith.constant 0 : i32
    %c0_i32_1 = arith.constant 0 : i32
    return %c0_i32, %c0_i32_0 : i32, i32
  }
  func.func @transform_9(%arg0: i32, %arg1: i32) -> (i32, i32) {
    %c0_i32 = arith.constant 0 : i32
    %c0_i32_0 = arith.constant 0 : i32
    %c0_i32_1 = arith.constant 0 : i32
    return %c0_i32, %c0_i32_0 : i32, i32
  }
  func.func @transform_10(%arg0: i32, %arg1: i32) -> (i32, i32) {
    %c0_i32 = arith.constant 0 : i32
    %c0_i32_0 = arith.constant 0 : i32
    %c0_i32_1 = arith.constant 0 : i32
    return %c0_i32, %c0_i32_0 : i32, i32
  }
  func.func @transform_11(%arg0: i32, %arg1: i32) -> (i32, i32) {
    %c0_i32 = arith.constant 0 : i32
    %c0_i32_0 = arith.constant 0 : i32
    %c0_i32_1 = arith.constant 0 : i32
    return %c0_i32, %c0_i32_0 : i32, i32
  }
  func.func @transform_12(%arg0: i32, %arg1: i32) -> (i32, i32) {
    %c0_i32 = arith.constant 0 : i32
    %c0_i32_0 = arith.constant 0 : i32
    %c0_i32_1 = arith.constant 0 : i32
    return %c0_i32, %c0_i32_0 : i32, i32
  }
  func.func @transform_13(%arg0: i32, %arg1: i32) -> (i32, i32) {
    %c0_i32 = arith.constant 0 : i32
    %c0_i32_0 = arith.constant 0 : i32
    %c0_i32_1 = arith.constant 0 : i32
    return %c0_i32, %c0_i32_0 : i32, i32
  }
  func.func @transform_14(%arg0: i32, %arg1: i32) -> (i32, i32) {
    %c0_i32 = arith.constant 0 : i32
    %c0_i32_0 = arith.constant 0 : i32
    %c0_i32_1 = arith.constant 0 : i32
    return %c0_i32, %c0_i32_0 : i32, i32
  }
  func.func @transform_15(%arg0: i32, %arg1: i32) -> (i32, i32) {
    %c0_i32 = arith.constant 0 : i32
    %c0_i32_0 = arith.constant 0 : i32
    %c0_i32_1 = arith.constant 0 : i32
    return %c0_i32, %c0_i32_0 : i32, i32
  }
  func.func @transform_16(%arg0: i32, %arg1: i32) -> (i32, i32) {
    %c0_i32 = arith.constant 0 : i32
    %c0_i32_0 = arith.constant 0 : i32
    return %arg1, %c0_i32 : i32, i32
  }
  func.func @transform_17(%arg0: i32, %arg1: i32) -> (i32, i32) {
    %c0_i32 = arith.constant 0 : i32
    %c0_i32_0 = arith.constant 0 : i32
    %c0_i32_1 = arith.constant 0 : i32
    return %c0_i32, %c0_i32_0 : i32, i32
  }
  func.func @transform_18(%arg0: i32, %arg1: i32) -> (i32, i32, i32, i32) {
    %c0_i32 = arith.constant 0 : i32
    %c0_i32_0 = arith.constant 0 : i32
    %c0_i32_1 = arith.constant 0 : i32
    return %arg0, %arg1, %c0_i32, %c0_i32_0 : i32, i32, i32, i32
  }
}

</mosaic_0001>

<bundles_post_ra>
// kernel: tpu_custom_call.1
= control target key start
LH: loop header
LB: loop body
LE: loop exit
PB: predicated region body
PF: predicated region fallthrough
CT: control target
= control target key end

     0   :  { %s4326_s0 = inlined_call_operand.vmem [shape: bf16[2,4,512], index: 0, kind: input, shape index: {}]   ;;  %s4327_s1 = inlined_call_operand.hbm [shape: bf16[2,16,256], index: 1, kind: input, shape index: {}]   ;;  %s4328_s2 = inlined_call_operand.hbm [shape: bf16[2,64,128], index: 2, kind: input, shape index: {}]   ;;  %s4329_s3 = inlined_call_operand.vmem [shape: bf16[2,256,64], index: 3, kind: input, shape index: {}]   ;;  %s4330_s4 = inlined_call_operand.vmem [shape: bf16[512,128], index: 4, kind: input, shape index: {}]   ;;  %s4331_s5 = inlined_call_operand.vmem [shape: f32[1,128], index: 5, kind: input, shape index: {}]   ;;  %s4332_s6 = inlined_call_operand.vmem [shape: bf16[256,128], index: 6, kind: input, shape index: {}]   ;;  %s4333_s7 = inlined_call_operand.vmem [shape: f32[1,128], index: 7, kind: input, shape index: {}]   ;;  %s4334_s8 = inlined_call_operand.hbm [shape: bf16[128,128], index: 8, kind: input, shape index: {}]   ;;  %s4335_s9 = inlined_call_operand.vmem [shape: f32[1,128], index: 9, kind: input, shape index: {}]   ;;  %s4336_s10 = inlined_call_operand.hbm [shape: bf16[64,128], index: 10, kind: input, shape index: {}]   ;;  %s4337_s11 = inlined_call_operand.vmem [shape: f32[1,128], index: 11, kind: input, shape index: {}]   ;;  %s4338_s12 = inlined_call_operand.vmem [shape: bf16[4,2], index: 12, kind: input, shape index: {}]   ;;  %s4339_s13 = inlined_call_operand.vmem [shape: bf16[4,2], index: 13, kind: input, shape index: {}]   ;;  %s4340_s14 = inlined_call_operand.vmem [shape: bf16[8,4], index: 14, kind: input, shape index: {}]   ;;  %s4341_s15 = inlined_call_operand.vmem [shape: bf16[8,4], index: 15, kind: input, shape index: {}]   ;;  %s4342_s16 = inlined_call_operand.vmem [shape: bf16[16,8], index: 16, kind: input, shape index: {}]   ;;  %s4343_s17 = inlined_call_operand.vmem [shape: bf16[16,8], index: 17, kind: input, shape index: {}]   ;;  %s4344_s18 = inlined_call_operand.hbm [shape: f32[2,16,16,128], index: 18, kind: output, shape index: {}]  }
   0x1   :  { %4359 = sst [smem:[#allocation26_spill]] %s4326_s0 }
   0x2   :  { %4360 = sst [smem:[#allocation27_spill]] %s4327_s1 }
   0x3   :  { %4361 = sst [smem:[#allocation28_spill]] %s4328_s2 }
   0x4   :  { %4362 = sst [smem:[#allocation29_spill]] %s4330_s4 }
   0x5   :  { %4363 = sst [smem:[#allocation30_spill]] %s4331_s5 }
   0x6   :  { %4364 = sst [smem:[#allocation31_spill]] %s4332_s6 }
   0x7   :  { %4365 = sst [smem:[#allocation32_spill]] %s4333_s7 }
   0x8   :  { %4366 = sst [smem:[#allocation33_spill]] %s4334_s8 }
   0x9   :  { %4367 = sst [smem:[#allocation34_spill]] %s4335_s9 }
   0xa   :  { %4368 = sst [smem:[#allocation35_spill]] %s4336_s10 }
   0xb   :  { %4369 = sst [smem:[#allocation36_spill]] %s4337_s11 }
   0xc   :  { %4370 = sst [smem:[#allocation37_spill]] %s4338_s12 }
   0xd   :  { %4371 = sst [smem:[#allocation38_spill]] %s4339_s13 }
   0xe   :  { %4372 = sst [smem:[#allocation39_spill]] %s4340_s14 }
   0xf   :  { %4373 = sst [smem:[#allocation40_spill]] %s4341_s15 }
  0x10   :  { %4374 = sst [smem:[#allocation41_spill]] %s4342_s16 }
  0x11   :  { %4375 = sst [smem:[#allocation42_spill]] %s4343_s17 }
  0x12   :  { %4376 = sst [smem:[#allocation43_spill]] %s4344_s18 }
  0x13   :  { %23 = vsyncpa [#allocation4], 0 }
  0x14   :  { %25 = vsyncpa [#allocation4 + $0x1], 0 }
  0x15   :  { %26 = vsyncpa [#allocation7], 0 }
  0x16   :  { %28 = vsyncpa [#allocation7 + $0x1], 0 }
  0x17   :  { %29 = vsyncpa [#allocation10], 0 }
  0x18   :  { %30 = vsyncpa [#allocation5], 0 }
  0x19   :  { %32 = vsyncpa [#allocation5 + $0x1], 0  ;;  %s3693_s27 = smov 0   ;;  %s3695_s28 = smov 0  }
  0x1a   :  { %s3697_s29 = smov 0   ;;  %s3699_s30 = smov 0  }
  0x1b   :  { %s3701_s0 = smov 0   ;;  %s3703_s19 = smov 0  }
  0x1c   :  { %s3705_s1 = smov 0   ;;  %s3707_s20 = smov 0  }
  0x1d   :  { %s3709_s21 = smov 0   ;;  %s3711_s22 = smov 0  }
  0x1e   :  { %s3713_s2 = smov 0  }
  0x1f LB: > { %4377 = sst [smem:[#allocation17_spill]] %s3544_s27  ;;  %s3747_s23 = sadd.s32 4294967295, %s3584_s2   ;;  %s3584_s2 = sphi %s3713_s2, %s38_s2   ;;  %s3580_s22 = sphi %s3711_s22, %s4430_s22   ;;  %s3576_s21 = sphi %s3709_s21, %s4422_s21   ;;  %s3572_s20 = sphi %s3707_s20, %s4429_s20   ;;  %s3568_s1 = sphi %s3705_s1, %s4421_s1   ;;  %s3564_s19 = sphi %s3703_s19, %s4420_s19   ;;  %s3560_s0 = sphi %s3701_s0, %s4428_s0   ;;  %s3556_s30 = sphi %s3699_s30, %s4427_s30   ;;  %s3552_s29 = sphi %s3697_s29, %s4426_s29   ;;  %s3548_s28 = sphi %s3695_s28, %s4425_s28   ;;  %s3544_s27 = sphi %s3693_s27, %s4424_s27  }
  0x20   : > { %4378 = sst [smem:[#allocation18_spill]] %s3564_s19  ;;  %s2726_s24 = sadd.s32 4294967294, %s3584_s2  }
  0x21   : > { %4379 = sst [smem:[#allocation19_spill]] %s3576_s21  ;;  %p96_p0 = scmp.ne.s32.totalorder %s3560_s0, %s3556_s30 }
  0x22   : > { %p97_p1 = scmp.eq.s32.totalorder %s3747_s23, 0  ;;  %p474_p2 = scmp.ne.s32.totalorder %s3552_s29, %s3548_s28 }
  0x23   : > { %p475_p4 = scmp.eq.s32.totalorder %s3747_s23, 3  ;;  %p480_p5 = scmp.ne.s32.totalorder %s3548_s28, %s3544_s27 }
  0x24   : > { %p3757_p3 = por %p97_p1, %p96_p0  ;;  %p481_p6 = scmp.eq.s32.totalorder %s2726_s24, 3 }
  0x25   : > { %p3764_p7 = por %p475_p4, %p474_p2  ;;  %p2727_p8 = scmp.ge.s32.totalorder %s3584_s2, 1 }
  0x26   : > { %p3769_p9 = por %p481_p6, %p480_p5  ;;  %p488_p10 = scmp.lt.s32.totalorder %s3584_s2, 5 }
  0x27   : > { %s4381_s18 = scalar_select %p3764_p7, 1, 0 }
  0x28   : > { %s4383_s11 = scalar_select %p3769_p9, 1, 0 }
  0x29   : > { %4382 = sst [smem:[#allocation20_spill]] %s4381_s18  ;;  %p3777_p11 = pnand %p2727_p8, %p488_p10 }
  0x2a   : > { %4384 = sst [smem:[#allocation21_spill]] %s4383_s11  ;;  %s3586_s24 = smov [#allocation8]  }
  0x2b   : > { %s4385_s8 = sld [smem:[#allocation33_spill]]  ;;  %p3202_p12 = pneg %p3777_p11 }
  0x2c   : > { %s513_s27 = sshll.u32 %s3586_s24, 4  ;;  %s4387_s10 = sld [smem:[#allocation35_spill]]  ;;  %s514_s27 = int_to_ptr.vmem [resolvable:$true] %s513_s27 }
  0x2d   : > { %p3203_p13 = pnand %p3202_p12, %p97_p1  ;;  %s4350_s11 = smov 64  }
  0x2e   : > { %s4351_s18 = smov 4   ;;  %s3589_s24 = smov [#allocation9]  }
  0x2f   : > { %s530_s15 = sshll.u32 %s3589_s24, 4  ;;  %s47_s25 = sadd.s32 1, %s3576_s21  ;;  %s531_s15 = int_to_ptr.vmem [resolvable:$true] %s530_s15 }
  0x30   : > { %s50_s30 = sadd.s32 1, %s3580_s22  ;;  %p48_p0 = scmp.ge.s32.totalorder %s47_s25, 2 }
  0x31   : > { %s511_s17 = sshll.u32 %s4385_s8, 4  ;;  %p90_p2 = scmp.ne.s32.totalorder %s3564_s19, %s3560_s0  ;;  %s512_s17 = int_to_ptr.hbm [resolvable:$true] %s511_s17 }
  0x32   : > { %s528_s8 = sshll.u32 %s4387_s10, 4  ;;  %s83_s10 = sadd.s32 1, %s3564_s19  ;;  %s529_s8 = int_to_ptr.hbm [resolvable:$true] %s528_s8 }
  0x33   : > { %3205 = dma.hbm_to_vmem [thread:$0]  (!%p3203_p13), %s512_s17, 1024, %s514_s27, [#allocation7], %s4350_s11, %s4350_s11, %s4351_s18  }
  0x34   : > { %3208 = dma.hbm_to_vmem [thread:$0]  (!%p3203_p13), %s529_s8, 512, %s531_s15, [#allocation10], %s4350_s11, %s4350_s11, %s4351_s18  }
  0x35   : > { %p91_p4 = scmp.eq.s32.totalorder %s3584_s2, 0  ;;  %s4432_s25 = smov (%p48_p0, %s47_s25), 0 }
  0x36   : > { %4388 = sst [smem:[#allocation22_spill]] %s4432_s25  ;;  %s4434_s30 = smov (!%p48_p0, %s50_s30), %s3580_s22 }
  0x37   : > { %p3803_p5 = por %p91_p4, %p90_p2  ;;  %s460_s27 = ssub.s32 %s3576_s21, %s4432_s25 }
  0x38   : > { %p52_p6 = scmp.ge.s32.totalorder %s4434_s30, 2  ;;  %p3222_p8 = scmp.lt.s32.totalorder %s3584_s2, 4 }
  0x39   : > { %s570_s8 = sand.u32 1, %s3564_s19   ;;  %s3101_s15 = sshll.u32 %s3580_s22, 4 }
  0x3a   : > { %s4436_s30 = smov (%p52_p6, %s4434_s30), 0  ;;  %s2731_s24 = sshll.u32 %s570_s8, 4 }
  0x3b   : > { %4390 = sst [smem:[#allocation23_spill]] %s4436_s30  ;;  %s80_s11 = ssub.s32 %s3580_s22, %s4436_s30 }
  0x3c   : > { %p81_p10 = scmp.eq.s32.totalorder %s80_s11, 0  ;;  %s461_s18 = sor.u32 %s460_s27, %s80_s11 }
  0x3d   : > { %p462_p12 = scmp.eq.s32.totalorder %s461_s18, 0  ;;  %s4391_s13 = sld [smem:[#allocation27_spill]] }
  0x3e   : > { %s3820_s21 = scalar_select %p81_p10, %s3564_s19, %s83_s10  }
  0x3f   : > { %s4393_s12 = sadd.s32 1, %s3552_s29  ;;  %s574_s4 = scalar_lea.vmem [#allocation3], %s2731_s24 }
  0x40   : > { %4392 = sst [smem:[#allocation24_spill]] %s3820_s21  ;;  %s582_s16 = sshll.u32 %s574_s4, 4  ;;  %s583_s16 = int_to_ptr.vmem [resolvable:$true] %s582_s16 }
  0x41   : > { %s3825_s5 = scalar_select %p462_p12, %s3552_s29, %s4393_s12  }
  0x42   : > { %p3831_p13 = pnand %p3222_p8, %p3803_p5  ;;  %s592_s7 = sand.u32 1, %s3584_s2  }
  0x43   : > { %s579_s25 = scalar_lea.hbm %s4391_s13, %s3101_s15  ;;  %4394 = sst [smem:[#allocation25_spill]] %s3825_s5 }
  0x44   : > { %s580_s6 = sshll.u32 %s579_s25, 4  ;;  %s571_s13 = scalar_lea.sflag [#allocation4], %s570_s8  ;;  %s581_s6 = int_to_ptr.hbm [resolvable:$true] %s580_s6 }
  0x45   : > { %s3590_s10 = smov 128   ;;  %s3591_s14 = smov 8  }
  0x46   : > { %3212 = dma.hbm_to_vmem [thread:$0]  (!%p3831_p13), %s581_s6, 256, %s583_s16, %s571_s13, %s3590_s10, %s3590_s10, %s3591_s14  }
  0x47   : > { %s2734_s12 = sshll.u32 %s570_s8, 5  ;;  %s3102_s18 = sshll.u32 %s3580_s22, 5 }
  0x48   : > { %s4396_s27 = sld [smem:[#allocation28_spill]]  ;;  %s596_s24 = scalar_lea.vmem [#allocation6], %s2734_s12 }
  0x49   : > { %s604_s30 = sshll.u32 %s596_s24, 4  ;;  %s593_s21 = scalar_lea.sflag [#allocation7], %s592_s7  ;;  %s605_s30 = int_to_ptr.vmem [resolvable:$true] %s604_s30 }
  0x4a   : > { %s4397_s19 = smov 4   ;;  %s4398_s5 = smov 64  }
  0x4b   : > { %s638_s6 = sand.u32 (!%p3777_p11), 1, %s3560_s0  }
  0x4c   : > { %636 = sbr.rel (%p3777_p11) target bundleno = 1302 (0x516), region = 92  ;;  %s2738_s16 = sshll.u32 (!%p3777_p11), %s638_s6, 4 }
  0x4d   : > { %s639_s8 = scalar_lea.sflag (!%p3777_p11), [#allocation4], %s638_s6  ;;  %s3850_s13 = scalar_lea.vmem (!%p3777_p11), [#allocation3], %s2738_s16 }
  0x4e   : > { %s601_s15 = scalar_lea.hbm %s4396_s27, %s3102_s18 }
  0x4f   : > { %s602_s17 = sshll.u32 %s601_s15, 4  ;;  %s603_s17 = int_to_ptr.hbm [resolvable:$true] %s602_s17 }
  0x50   : > { %3215 = dma.hbm_to_vmem [thread:$0]  (!%p3831_p13), %s603_s17, 512, %s605_s30, %s593_s21, %s4398_s5, %s4398_s5, %s4397_s19  }
  0x51   : > { %3523 = dma.done.wait (%p3757_p3), %s639_s8, 256  }
  0x52   : > { %3525 = vsyncadd (%p3757_p3), %s639_s8, 4294967040  ;;  %s648_s11 = sand.u32 1, %s3747_s23   ;;  %s2739_s7 = sshll.u32 %s638_s6, 5 }
  0x53   : > { %s649_s5 = scalar_lea.sflag [#allocation7], %s648_s11  ;;  %s3857_s19 = scalar_lea.vmem [#allocation6], %s2739_s7 }
  0x54   : > { %3527 = dma.done.wait (%p3757_p3), %s649_s5, 512  }
  0x55   : > { %3529 = vsyncadd (%p3757_p3), %s649_s5, 4294966784 }
  0x56   : > { %3531 = dma.done.wait (%p97_p1), [#allocation7], 1024  }
  0x57   : > { %3533 = vsyncadd (%p97_p1), [#allocation7], 4294966272 }
  0x58   : > { %3535 = dma.done.wait (%p97_p1), [#allocation10], 512  }
  0x59   : > { %3537 = vsyncadd (%p97_p1), [#allocation10], 4294966784  ;;  %s4358_s9 = sand.u32 1, %s3548_s28   ;;  %p739_p3 = scmp.lt.s32.totalorder %s3572_s20, 1 }
  0x5a   : > { %s2742_s21 = sshll.u32 %s4358_s9, 7  ;;  %s3876_s26 = sshll.u32 %s3568_s1, 4 }
  0x5b   : > { %p747_p11 = scmp.lt.s32.totalorder %s3876_s26, 31  ;;  %s4399_s25 = sld [smem:[#allocation26_spill]] }
  0x5c   : > { %s740_s30 = scalar_select %p739_p3, %s3572_s20, 1 }
  0x5d   : > { %s748_s10 = scalar_select %p747_p11, %s3876_s26, 31 }
  0x5e   : > { %s3103_s23 = sshll.u32 %s740_s30, 3  ;;  %s2746_s14 = sshll.u32 %s740_s30, 5 }
  0x5f   : > { %s750_s27 = sadd.s32 %s2746_s14, %s748_s10  ;;  %p754_p1 = scmp.lt.s32.totalorder %s3568_s1, 1 }
  0x60   : > { %s2747_s15 = sshll.u32 %s750_s27, 2  ;;  %s4400_s5 = sld [smem:[#allocation41_spill]] }
  0x61   : > { %s3884_s4 = scalar_lea.vmem %s4399_s25, %s3103_s23  ;;  %s3890_s6 = scalar_lea.vmem %s4329_s3, %s2747_s15 }
  0x62   : > { %s755_s16 = scalar_select %p754_p1, %s3568_s1, 1 }
  0x63   : > { %s3898_s30 = scalar_lea.vmem [#allocation11], %s2742_s21  ;;  %p2749_p0 = scmp.ne.s32.totalorder %s3568_s1, 0 }
  0x64   : > { %s2748_s8 = sshll.u32 %s755_s16, 2  ;;  %s4401_s14 = sld [smem:[#allocation29_spill]] (!%p2749_p0) }
  0x65   : > { %763 = sbr.rel (%p2749_p0) target bundleno = 934 (0x3a6), region = 112  ;;  %s4402_s10 = sld [smem:[#allocation31_spill]] (!%p2749_p0) }
  0x66   : > { %s3896_s9 = scalar_lea.vmem %s4400_s5, %s2748_s8  ;;  %s4403_s1 = sld [smem:[#allocation30_spill]] (!%p2749_p0) }
  0x67   : > { %s4404_s11 = sld [smem:[#allocation37_spill]] (!%p2749_p0) }
  0x68   : > { %s4405_s27 = sld [smem:[#allocation38_spill]] (!%p2749_p0) }
  0x69   : > { %s4407_s16 = sld [smem:[#allocation39_spill]] (!%p2749_p0) }
  0x6a   : > { %v3111_v0 = vld [vmem:[%s4401_s14 + $0x38] sm:$0xff]  ;;  %v3110_v4 = vld [vmem:[%s4401_s14 + $0x30] sm:$0xff]  ;;  %v3109_v8 = vld [vmem:[%s4401_s14 + $0x28] sm:$0xff]  ;;  %vm1104_vm0 = vcmask 1040384   ;;  %vm1100_vm1 = vcmask 15360   ;;  %vm1145_vm2 = vcmask 1047556  }
  0x6b   : > { %v3119_v1 = vld [vmem:[%s4401_s14 + $0x78] sm:$0xff]  ;;  %1035 = vmatpush.bf16.msra.mxu0 %v3111_v0  ;;  %v3118_v5 = vld [vmem:[%s4401_s14 + $0x70] sm:$0xff]  ;;  %v3117_v9 = vld [vmem:[%s4401_s14 + $0x68] sm:$0xff]  ;;  %vm1449_vm3 = vcmask 1041408   ;;  %vm1445_vm4 = vcmask 31744   ;;  %s4409_s23 = sld [smem:[#allocation34_spill]] }
  0x6c   : > { %v3127_v2 = vld [vmem:[%s4401_s14 + $0xb8] sm:$0xff]  ;;  %1048 = vmatpush.bf16.msra.mxu1 %v3119_v1  ;;  %v3126_v6 = vld [vmem:[%s4401_s14 + $0xb0] sm:$0xff]  ;;  %v3125_v10 = vld [vmem:[%s4401_s14 + $0xa8] sm:$0xff] }
  0x6d   : > { %v3135_v3 = vld [vmem:[%s4401_s14 + $0xf8] sm:$0xff]  ;;  %1061 = vmatpush.bf16.msra.mxu2 %v3127_v2  ;;  %v3134_v7 = vld [vmem:[%s4401_s14 + $0xf0] sm:$0xff]  ;;  %v3133_v11 = vld [vmem:[%s4401_s14 + $0xe8] sm:$0xff] }
  0x6e   : > { %1074 = vmatpush.bf16.msra.mxu3 %v3135_v3  ;;  %v3108_v12 = vld [vmem:[%s4401_s14 + $0x20] sm:$0xff]  ;;  %v3107_v17 = vld [vmem:[%s4401_s14 + $0x18] sm:$0xff]  ;;  %v3106_v21 = vld [vmem:[%s4401_s14 + $0x10] sm:$0xff] }
  0x6f   : > { %1036 = vmatpush.bf16.msra.mxu0 %v3110_v4  ;;  %v3116_v13 = vld [vmem:[%s4401_s14 + $0x60] sm:$0xff]  ;;  %v3115_v18 = vld [vmem:[%s4401_s14 + $0x58] sm:$0xff]  ;;  %v3114_v22 = vld [vmem:[%s4401_s14 + $0x50] sm:$0xff] }
  0x70   : > { %1049 = vmatpush.bf16.msra.mxu1 %v3118_v5  ;;  %v764_v14 = vld [vmem:[%s3884_s4] sm:$0xff]  ;;  %v3123_v19 = vld [vmem:[%s4401_s14 + $0x98] sm:$0xff]  ;;  %v3122_v23 = vld [vmem:[%s4401_s14 + $0x90] sm:$0xff] }
  0x71   : > { %1062 = vmatpush.bf16.msra.mxu2 %v3126_v6  ;;  %v3124_v15 = vld [vmem:[%s4401_s14 + $0xa0] sm:$0xff]  ;;  %834 = vst [vmem:[#allocation1] ss:$4 sm:$0xff] %v764_v14  ;;  %v3131_v20 = vld [vmem:[%s4401_s14 + $0xd8] sm:$0xff]  ;;  %v3130_v24 = vld [vmem:[%s4401_s14 + $0xd0] sm:$0xff] }
  0x72   : > { %1075 = vmatpush.bf16.msra.mxu3 %v3134_v7  ;;  %v3132_v16 = vld [vmem:[%s4401_s14 + $0xe0] sm:$0xff]  ;;  %v3105_v25 = vld [vmem:[%s4401_s14 + $0x8] sm:$0xff]  ;;  %v3145_v37 = vld [vmem:[%s4402_s10 + $0x38] sm:$0xff] }
  0x73   : > { %1037 = vmatpush.bf16.msra.mxu0 %v3109_v8  ;;  %v3113_v26 = vld [vmem:[%s4401_s14 + $0x48] sm:$0xff]  ;;  %v3104_v29 = vld [vmem:[%s4401_s14] sm:$0xff]  ;;  %v3153_v38 = vld [vmem:[%s4402_s10 + $0x78] sm:$0xff] }
  0x74   : > { %1050 = vmatpush.bf16.msra.mxu1 %v3117_v9  ;;  %v3121_v27 = vld [vmem:[%s4401_s14 + $0x88] sm:$0xff]  ;;  %v3112_v30 = vld [vmem:[%s4401_s14 + $0x40] sm:$0xff]  ;;  %v3144_v39 = vld [vmem:[%s4402_s10 + $0x30] sm:$0xff] }
  0x75   : > { %1063 = vmatpush.bf16.msra.mxu2 %v3125_v10  ;;  %v3129_v28 = vld [vmem:[%s4401_s14 + $0xc8] sm:$0xff]  ;;  %v3120_v31 = vld [vmem:[%s4401_s14 + $0x80] sm:$0xff]  ;;  %v3152_v40 = vld [vmem:[%s4402_s10 + $0x70] sm:$0xff] }
  0x76   : > { %1076 = vmatpush.bf16.msra.mxu3 %v3133_v11  ;;  %v3128_v32 = vld [vmem:[%s4401_s14 + $0xc0] sm:$0xff]  ;;  %v3143_v42 = vld [vmem:[%s4402_s10 + $0x28] sm:$0xff]  ;;  %v3141_v50 = vld [vmem:[%s4402_s10 + $0x18] sm:$0xff] }
  0x77   : > { %1038 = vmatpush.bf16.msra.mxu0 %v3108_v12  ;;  %v3326_v41 = vld [vmem:[%s4403_s1] ss:$0 sm:$0xff]  ;;  %v3151_v43 = vld [vmem:[%s4402_s10 + $0x68] sm:$0xff]  ;;  %v3149_v51 = vld [vmem:[%s4402_s10 + $0x58] sm:$0xff]  ;;  %s4406_s1 = sld [smem:[#allocation32_spill]] }
  0x78   : > { %1051 = vmatpush.bf16.msra.mxu1 %v3116_v13  ;;  %v835_v33 = vld.sshfl [vmem:[#allocation1] sm:$0xff pattern:$0x73625140]  ;;  %v836_v34 = vld.sshfl [vmem:[#allocation1 + $0x8] sm:$0xff pattern:$0x73625140] }
  0x79   : > { %1064 = vmatpush.bf16.msra.mxu2 %v3124_v15  ;;  %v837_v35 = vld.sshfl [vmem:[#allocation1 + $0x10] sm:$0xff pattern:$0x73625140]  ;;  %v838_v36 = vld.sshfl [vmem:[#allocation1 + $0x18] sm:$0xff pattern:$0x73625140] }
  0x7a   : > { %1077 = vmatpush.bf16.msra.mxu3 %v3132_v16  ;;  %v3142_v47 = vld [vmem:[%s4402_s10 + $0x20] sm:$0xff]  ;;  %v3140_v58 = vld [vmem:[%s4402_s10 + $0x10] sm:$0xff]  ;;  %v3139_v63 = vld [vmem:[%s4402_s10 + $0x8] sm:$0xff] }
  0x7b   : > { %1039 = vmatpush.bf16.msra.mxu0 %v3107_v17  ;;  %v3150_v48 = vld [vmem:[%s4402_s10 + $0x60] sm:$0xff]  ;;  %v3148_v59 = vld [vmem:[%s4402_s10 + $0x50] sm:$0xff]  ;;  %v3147_v9 = vld [vmem:[%s4402_s10 + $0x48] sm:$0xff] }
  0x7c   : > { %1052 = vmatpush.bf16.msra.mxu1 %v3115_v18  ;;  %v1090_v7 = vld [vmem:[%s4404_s11] sm:$0x3]  ;;  %v2882_v12 = vld [vmem:[%s3850_s13] sm:$0xf]  ;;  %v3136_v15 = vld [vmem:[%s3850_s13 + $0x4] sm:$0xf] }
  0x7d   : > { %1065 = vmatpush.bf16.msra.mxu2 %v3123_v19  ;;  %v3138_v10 = vld [vmem:[%s4402_s10] sm:$0xff]  ;;  %v3592_v18 = vmov 1934713408   ;;  %s4408_s11 = sld [smem:[#allocation40_spill]] }
  0x7e   : > { %1078 = vmatpush.bf16.msra.mxu3 %v3131_v20  ;;  %v3146_v11 = vld [vmem:[%s4402_s10 + $0x40] sm:$0xff]  ;;  %v1141_v19 = vunpack.c.l.s4 %v3592_v18 }
  0x7f   : > { %1040 = vmatpush.bf16.msra.mxu0 %v3106_v21  ;;  %v3137_v13 = vld [vmem:[%s3850_s13 + $0x4] sm:$0xf0]  ;;  %v2884_v16 = vld [vmem:[%s3850_s13 + $0x8] sm:$0xf0] }
  0x80   : > { %1053 = vmatpush.bf16.msra.mxu1 %v3114_v22  ;;  %v2883_v14 = vor.u32 %v3137_v13, %v2882_v12  ;;  %v2887_v17 = vor.u32 %v3136_v15, %v2884_v16  ;;  %v4060_v21 = vunpack.c.0.s8 %v1141_v19 }
  0x81   : > { %1066 = vmatpush.bf16.msra.mxu2 %v3122_v23 }
  0x82   : > { %1079 = vmatpush.bf16.msra.mxu3 %v3130_v24 }
  0x83   : > { %1041 = vmatpush.bf16.msra.mxu0 %v3105_v25 }
  0x84   : > { %1054 = vmatpush.bf16.msra.mxu1 %v3113_v26 }
  0x85   : > { %1067 = vmatpush.bf16.msra.mxu2 %v3121_v27 }
  0x86   : > { %1080 = vmatpush.bf16.msra.mxu3 %v3129_v28 }
  0x87   : > { %1042 = vmatpush.bf16.msra.mxu0 %v3104_v29 }
  0x88   : > { %1055 = vmatpush.bf16.msra.mxu1 %v3112_v30 }
  0x89   : > { %1068 = vmatpush.bf16.msra.mxu2 %v3120_v31 }
  0x8a   : > { %1081 = vmatpush.bf16.msra.mxu3 %v3128_v32  ;;  %1043 = vmatmul.bf16.vlgmr.msra.gmra.mxu0 %v835_v33 }
  0x8b   : > { %1056 = vmatmul.bf16.vlgmr.msra.gmra.mxu1 %v836_v34 }
  0x8c   : > { %1069 = vmatmul.bf16.vlgmr.msra.gmra.mxu2 %v837_v35 }
  0x8d   : > { %1082 = vmatmul.bf16.vlgmr.msra.gmra.mxu3 %v838_v36  ;;  %1310 = vmatpush.bf16.msrb.mxu2 %v3145_v37 }
  0x8e   : > { %1324 = vmatpush.bf16.msrb.mxu3 %v3153_v38  ;;  %v1091_v38 = vld [vmem:[%s4405_s27] sm:$0x3] }
  0x91   : > { %1311 = vmatpush.bf16.msrb.mxu2 %v3144_v39 }
  0x92   : > { %1325 = vmatpush.bf16.msrb.mxu3 %v3152_v40 }
  0x95   : > { %1312 = vmatpush.bf16.msrb.mxu2 %v3143_v42 }
  0x96   : > { %1326 = vmatpush.bf16.msrb.mxu3 %v3151_v43 }
  0x99   : > { %1313 = vmatpush.bf16.msrb.mxu2 %v3142_v47 }
  0x9a   : > { %1327 = vmatpush.bf16.msrb.mxu3 %v3150_v48 }
  0x9d   : > { %1314 = vmatpush.bf16.msrb.mxu2 %v3141_v50  ;;  %v3327_v50 = vld [vmem:[%s4406_s1] ss:$0 sm:$0xff] }
  0x9e   : > { %1328 = vmatpush.bf16.msrb.mxu3 %v3149_v51 }
  0xa1   : > { %1315 = vmatpush.bf16.msrb.mxu2 %v3140_v58 }
  0xa2   : > { %1329 = vmatpush.bf16.msrb.mxu3 %v3148_v59 }
  0xa5   : > { %1316 = vmatpush.bf16.msrb.mxu2 %v3139_v63 }
  0xa6   : > { %1330 = vmatpush.bf16.msrb.mxu3 %v3147_v9 }
  0xa9   : > { %1317 = vmatpush.bf16.msrb.mxu2 %v3138_v10 }
  0xaa   : > { %1331 = vmatpush.bf16.msrb.mxu3 %v3146_v11 }
  0xac   : > { %1318 = vmatmul.bf16.vlgmr.msrb.gmra.mxu2 %v2883_v14  ;;  %v3163_v14 = vld [vmem:[#allocation8 + $0x28] sm:$0xff] }
  0xad   : > { %1332 = vmatmul.bf16.vlgmr.msrb.gmra.mxu3 %v2887_v17 }
 0x107   : > { %v1044_v44 = vpop.f32.mrf.mxu0 }
 0x108   : > { %v1057_v45 = vpop.f32.mrf.mxu1  ;;  %v1045_v46 = vadd.f32 %v3326_v41, %v1044_v44 }
 0x10a   : > { %v1058_v49 = vadd.f32 %v1057_v45, %v1045_v46 }
 0x10f   : > { %v1070_v52 = vpop.f32.mrf.mxu2  ;;  %v1046_v55 = vpop.f32.mrf.mxu0 }
 0x110   : > { %v1083_v53 = vpop.f32.mrf.mxu3  ;;  %v1071_v54 = vadd.f32 %v1070_v52, %v1058_v49  ;;  %v1059_v56 = vpop.f32.mrf.mxu1 }
 0x112   : > { %v1084_v57 = vadd.f32 %v1083_v53, %v1071_v54 }
 0x114   : > { %v1088_v60 = vrot.slane %v1084_v57, 2  ;;  %v1092_v61 = vpack.c.bf16 %v1084_v57, %v1084_v57 }
 0x116   : > { %v1093_v62 = vpack.c.bf16 %v1088_v60, %v1088_v60  ;;  %v1097_v3 = vshrl.u32 %v1092_v61, 16 }
 0x117   : > { %v1072_v0 = vpop.f32.mrf.mxu2 }
 0x118   : > { %v1085_v1 = vpop.f32.mrf.mxu3  ;;  %v1096_v2 = vpack.i.b16 %v1093_v62, %v1092_v61  ;;  %v1098_v4 = vshrl.u32 %v1093_v62, 16 }
 0x119   : > { %v3165_v1 = vld [vmem:[#allocation8 + $0x38] sm:$0xff] }
 0x11a   : > { %v1106_v5 = vsel %vm1104_vm0, %v1096_v2, 0  ;;  %v1099_v6 = vpack.i.b16 %v1098_v4, %v1097_v3  ;;  %1684 = vmatpush.bf16.msra.mxu2 %v3165_v1 }
 0x11b   : > { %1118 = vmatpush.bf16.msrb.mxu0 %v1106_v5  ;;  %v3164_v5 = vld [vmem:[#allocation8 + $0x30] sm:$0xff] }
 0x11c   : > { %v1109_v8 = vsel %vm1104_vm0, %v1099_v6, 0 }
 0x11d   : > { %1131 = vmatpush.bf16.msrb.mxu1 %v1109_v8 }
 0x11e   : > { %2878 = vmatmul.msk.bf16.vlgmr.msrb.gmra.mxu0 %vm1100_vm1, %v1090_v7  ;;  %1685 = vmatpush.bf16.msra.mxu2 %v3164_v5 }
 0x120   : > { %2879 = vmatmul.msk.bf16.vlgmr.msrb.gmra.mxu1 %vm1100_vm1, %v1090_v7 }
 0x122   : > { %1686 = vmatpush.bf16.msra.mxu2 %v3163_v14 }
 0x12f   : > { %v1319_v46 = vpop.f32.mrf.mxu2 }
 0x130   : > { %v1333_v47 = vpop.f32.mrf.mxu3  ;;  %v1320_v52 = vadd.f32 %v3327_v50, %v1319_v46 }
 0x132   : > { %v1334_v57 = vadd.f32 %v1333_v47, %v1320_v52 }
 0x134   : > { %v1340_v59 = vrot.slane %v1334_v57, 4 }
 0x137   : > { %v1321_v51 = vpop.f32.mrf.mxu2 }
 0x138   : > { %v1322_v54 = vadd.f32 %v3327_v50, %v1321_v51  ;;  %v1335_v55 = vpop.f32.mrf.mxu3  ;;  %v3593_v50 = vmov 1983009808  }
 0x139   : > { %v1534_v51 = vunpack.c.l.s4 %v3593_v50 }
 0x13a   : > { %v1336_v58 = vadd.f32 %v1335_v55, %v1322_v54 }
 0x13c   : > { %v1341_v63 = vrot.slane %v1336_v58, 4 }
 0x19b   : > { %v1120_v20 = vpop.f32.mrf.mxu0 }
 0x19d   : > { %v1133_v22 = vpop.f32.mrf.mxu1 }
 0x19e   : > { %v1137_v23 = vpack.c.bf16 %v1133_v22, %v1120_v20 }
 0x1a0   : > { %v1139_v24 = vrot.slane %v1137_v23, 4  ;;  %v1143_v25 = vperm.slane %v1137_v23, %v4060_v21 }
 0x1a2   : > { %v1144_v26 = vrot.slane %v1143_v25, 4  ;;  %v1151_v27 = vperm.slane %v1139_v24, %v4060_v21  ;;  %v1157_v28 = vshrl.u32 %v1143_v25, 16 }
 0x1a3   : > { %v1122_v29 = vpop.f32.mrf.mxu0 }
 0x1a4   : > { %v1156_v30 = vpack.i.b16 %v1151_v27, %v1143_v25  ;;  %v1158_v31 = vshrl.u32 %v1151_v27, 16  ;;  %v1146_v32 = vsel %vm1145_vm2, 0, %v1144_v26  ;;  %v1152_v33 = vrot.slane %v1151_v27, 4  ;;  %v3162_v25 = vld [vmem:[#allocation8 + $0x20] sm:$0xff]  ;;  %v1411_v29 = vld [vmem:[%s4407_s16] sm:$0xf] }
 0x1a5   : > { %v1135_v34 = vpop.f32.mrf.mxu1  ;;  %v1163_v40 = vshrl.u32 %v1146_v32, 16  ;;  %1687 = vmatpush.bf16.msra.mxu2 %v3162_v25 }
 0x1a6   : > { %v1348_v35 = vsel %vm1104_vm0, %v1156_v30, 0  ;;  %v1159_v36 = vpack.i.b16 %v1158_v31, %v1157_v28  ;;  %v1153_v37 = vsel %vm1145_vm2, 0, %v1152_v33 }
 0x1a7   : > { %1357 = vmatpush.bf16.msra.mxu0 %v1348_v35  ;;  %v1162_v39 = vpack.i.b16 %v1153_v37, %v1146_v32  ;;  %v1164_v41 = vshrl.u32 %v1153_v37, 16 }
 0x1a8   : > { %v1364_v42 = vsel %vm1104_vm0, %v1159_v36, 0  ;;  %v3161_v36 = vld [vmem:[#allocation8 + $0x18] sm:$0xff] }
 0x1a9   : > { %1373 = vmatpush.bf16.msra.mxu1 %v1364_v42  ;;  %v1380_v43 = vsel %vm1104_vm0, %v1162_v39, 0  ;;  %v1165_v44 = vpack.i.b16 %v1164_v41, %v1163_v40  ;;  %1688 = vmatpush.bf16.msra.mxu2 %v3161_v36  ;;  %v3159_v39 = vld [vmem:[#allocation8 + $0x8] sm:$0xff]  ;;  %v3158_v40 = vld [vmem:[#allocation8] sm:$0xff] }
 0x1aa   : > { %2952 = vmatmul.msk.bf16.vlgmr.msra.gmra.mxu0 %vm1100_vm1, %v1091_v38  ;;  %v3154_v41 = vld [vmem:[%s3857_s19] sm:$0xff]  ;;  %v3155_v42 = vld [vmem:[%s3857_s19 + $0x8] sm:$0xff] }
 0x1ab   : > { %1389 = vmatpush.bf16.msrb.mxu0 %v1380_v43  ;;  %v1396_v45 = vsel %vm1104_vm0, %v1165_v44, 0  ;;  %v3156_v43 = vld [vmem:[%s3857_s19 + $0x10] sm:$0xff] }
 0x1ac   : > { %2953 = vmatmul.msk.bf16.vlgmr.msra.gmra.mxu1 %vm1100_vm1, %v1091_v38 }
 0x1ad   : > { %1405 = vmatpush.bf16.msrb.mxu1 %v1396_v45 }
 0x1ba   : > { %2954 = vmatmul.msk.bf16.vlgmr.msrb.gmra.mxu0 %vm1100_vm1, %v1091_v38 }
 0x1bc   : > { %2955 = vmatmul.msk.bf16.vlgmr.msrb.gmra.mxu1 %vm1100_vm1, %v1091_v38  ;;  %v3160_v38 = vld [vmem:[#allocation8 + $0x10] sm:$0xff] }
 0x1bd   : > { %1689 = vmatpush.bf16.msra.mxu2 %v3160_v38 }
 0x1c1   : > { %1690 = vmatpush.bf16.msra.mxu2 %v3159_v39 }
 0x1c5   : > { %1691 = vmatpush.bf16.msra.mxu2 %v3158_v40 }
 0x1c8   : > { %1692 = vmatmul.bf16.vlgmr.msra.gmra.mxu2 %v3154_v41 }
 0x1d8   : > { %1697 = vmatmul.bf16.gmra.mxu2 %v3155_v42 }
 0x1e8   : > { %1702 = vmatmul.bf16.gmra.mxu2 %v3156_v43 }
 0x227   : > { %v1359_v48 = vpop.f32.mrf.mxu0 }
 0x228   : > { %v1360_v61 = vadd.f32 %v1359_v48, %v1334_v57  ;;  %v3157_v57 = vld [vmem:[%s3857_s19 + $0x18] sm:$0xff] }
 0x229   : > { %v1375_v49 = vpop.f32.mrf.mxu1  ;;  %1707 = vmatmul.bf16.gmra.mxu2 %v3157_v57 }
 0x22a   : > { %v1376_v2 = vadd.f32 %v1375_v49, %v1340_v59  ;;  %v1413_v6 = vpack.c.bf16 %v1360_v61, %v1360_v61 }
 0x22c   : > { %v1423_v9 = vpack.c.bf16 %v1376_v2, %v1376_v2 }
 0x22f   : > { %v1361_v53 = vpop.f32.mrf.mxu0 }
 0x231   : > { %v1377_v56 = vpop.f32.mrf.mxu1 }
 0x232   : > { %v4100_v56 = vunpack.c.0.s8 %v1534_v51  ;;  %v3328_v51 = vld [vmem:[%s4409_s23] ss:$0 sm:$0xff] }
 0x237   : > { %v1391_v60 = vpop.f32.mrf.mxu0 }
 0x238   : > { %v1392_v62 = vadd.f32 %v1391_v60, %v1336_v58 }
 0x239   : > { %v1407_v0 = vpop.f32.mrf.mxu1 }
 0x23a   : > { %v1414_v3 = vpack.c.bf16 %v1392_v62, %v1392_v62  ;;  %v1408_v4 = vadd.f32 %v1407_v0, %v1341_v63 }
 0x23c   : > { %v1415_v7 = vrot.slane %v1414_v3, 4  ;;  %v1424_v8 = vpack.c.bf16 %v1408_v4, %v1408_v4 }
 0x23e   : > { %v1416_v10 = vsel %vm1145_vm2, %v1415_v7, %v1413_v6  ;;  %v1425_v11 = vrot.slane %v1424_v8, 4 }
 0x23f   : > { %v1420_v12 = vperm.slane %v1416_v10, %v4060_v21  ;;  %v1393_v13 = vpop.f32.mrf.mxu0 }
 0x240   : > { %v1426_v15 = vsel %vm1145_vm2, %v1425_v11, %v1423_v9 }
 0x241   : > { %v1430_v16 = vperm.slane %v1426_v15, %v4060_v21  ;;  %v1409_v17 = vpop.f32.mrf.mxu1  ;;  %v1421_v18 = vrot.slane %v1420_v12, 4  ;;  %v1436_v19 = vshrl.u32 %v1420_v12, 16 }
 0x243   : > { %v1435_v20 = vpack.i.b16 %v1430_v16, %v1420_v12  ;;  %v1437_v22 = vshrl.u32 %v1430_v16, 16  ;;  %v1422_v23 = vsel %vm1145_vm2, 0, %v1421_v18  ;;  %v1431_v24 = vrot.slane %v1430_v16, 4 }
 0x244   : > { %v1442_v31 = vshrl.u32 %v1422_v23, 16 }
 0x245   : > { %v1451_v26 = vsel %vm1449_vm3, %v1435_v20, 0  ;;  %v1438_v27 = vpack.i.b16 %v1437_v22, %v1436_v19  ;;  %v1432_v28 = vsel %vm1145_vm2, 0, %v1431_v24  ;;  %v1412_v24 = vld [vmem:[%s4408_s11] sm:$0xf] }
 0x246   : > { %1469 = vmatpush.bf16.msra.mxu1 %v1451_v26  ;;  %v1441_v30 = vpack.i.b16 %v1432_v28, %v1422_v23  ;;  %v1443_v32 = vshrl.u32 %v1432_v28, 16 }
 0x247   : > { %v1454_v33 = vsel %vm1449_vm3, %v1438_v27, 0 }
 0x248   : > { %1482 = vmatpush.bf16.msra.mxu3 %v1454_v33  ;;  %v1457_v34 = vsel %vm1449_vm3, %v1441_v30, 0  ;;  %v1444_v35 = vpack.i.b16 %v1443_v32, %v1442_v31 }
 0x249   : > { %2956 = vmatmul.msk.bf16.vlgmr.msra.gmra.mxu1 %vm1445_vm4, %v1411_v29  ;;  %1495 = vmatpush.bf16.msra.mxu0 %v1457_v34 }
 0x24a   : > { %v1460_v37 = vsel %vm1449_vm3, %v1444_v35, 0 }
 0x24b   : > { %2957 = vmatmul.msk.bf16.vlgmr.msra.gmra.mxu3 %vm1445_vm4, %v1411_v29  ;;  %1508 = vmatpush.bf16.msrb.mxu1 %v1460_v37  ;;  %v1693_v38 = vpop.f32.mrf.mxu2 }
 0x24c   : > { %2958 = vmatmul.msk.bf16.vlgmr.msra.gmra.mxu0 %vm1445_vm4, %v1411_v29 }
 0x253   : > { %v1695_v39 = vpop.f32.mrf.mxu2 }
 0x259   : > { %2959 = vmatmul.msk.bf16.vlgmr.msrb.gmra.mxu1 %vm1445_vm4, %v1411_v29 }
 0x25b   : > { %v1698_v40 = vpop.f32.mrf.mxu2 }
 0x263   : > { %v1700_v41 = vpop.f32.mrf.mxu2 }
 0x26b   : > { %v1703_v42 = vpop.f32.mrf.mxu2 }
 0x2c6   : > { %v1471_v44 = vpop.f32.mrf.mxu1 }
 0x2c9   : > { %v1497_v45 = vpop.f32.mrf.mxu0 }
 0x2ce   : > { %v1473_v46 = vpop.f32.mrf.mxu1  ;;  %v1484_v47 = vpop.f32.mrf.mxu3 }
 0x2cf   : > { %v1514_v48 = vpack.c.bf16 %v1484_v47, %v1471_v44  ;;  %v1705_v47 = vpop.f32.mrf.mxu2 }
 0x2d1   : > { %v1517_v49 = vrot.slane %v1514_v48, 4  ;;  %v1499_v52 = vpop.f32.mrf.mxu0  ;;  %v1523_v55 = vshrl.u32 %v1514_v48, 16 }
 0x2d3   : > { %v1524_v53 = vshrl.u32 %v1517_v49, 16  ;;  %v1522_v54 = vpack.i.b16 %v1517_v49, %v1514_v48 }
 0x2d5   : > { %v1525_v60 = vpack.i.b16 %v1524_v53, %v1523_v55  ;;  %v1536_v62 = vperm.slane %v1522_v54, %v4100_v56  ;;  %v1706_v54 = vadd.f32 %v3328_v51, %v1705_v47 }
 0x2d6   : > { %v1510_v58 = vpop.f32.mrf.mxu1  ;;  %v1486_v59 = vpop.f32.mrf.mxu3 }
 0x2d7   : > { %v1515_v61 = vpack.c.bf16 %v1510_v58, %v1497_v45  ;;  %v1562_v0 = vperm.slane %v1525_v60, %v4100_v56  ;;  %v1544_v4 = vrot.slane %v1536_v62, 4  ;;  %v1708_v53 = vpop.f32.mrf.mxu2  ;;  %v1704_v58 = vadd.f32 %v3328_v51, %v1703_v42 }
 0x2d8   : > { %v1696_v60 = vadd.f32 %v3328_v51, %v1695_v39 }
 0x2d9   : > { %v1519_v63 = vrot.slane %v1515_v61, 4  ;;  %v1529_v2 = vshrl.u32 %v1515_v61, 16  ;;  %v1570_v11 = vrot.slane %v1562_v0, 4 }
 0x2db   : > { %v1528_v1 = vpack.i.b16 %v1519_v63, %v1515_v61  ;;  %v1530_v3 = vshrl.u32 %v1519_v63, 16 }
 0x2dd   : > { %v1531_v5 = vpack.i.b16 %v1530_v3, %v1529_v2  ;;  %v1541_v6 = vperm.slane %v1528_v1, %v4100_v56  ;;  %v1694_v3 = vadd.f32 %v3328_v51, %v1693_v38 }
 0x2de   : > { %v1512_v7 = vpop.f32.mrf.mxu1 }
 0x2df   : > { %v1542_v8 = vrot.slane %v1541_v6, 4  ;;  %v1567_v9 = vperm.slane %v1531_v5, %v4100_v56  ;;  %v1545_v10 = vsel %vm1145_vm2, %v1541_v6, %v1544_v4  ;;  %v1710_v2 = vpop.f32.mrf.mxu2  ;;  %v1701_v6 = vadd.f32 %v3328_v51, %v1700_v41 }
 0x2e0   : > { %v1553_v12 = vperm.slane %v1545_v10, %v4060_v21 }
 0x2e1   : > { %v1543_v13 = vsel %vm1145_vm2, %v1542_v8, %v1536_v62  ;;  %v1568_v14 = vrot.slane %v1567_v9, 4  ;;  %v1571_v15 = vsel %vm1145_vm2, %v1567_v9, %v1570_v11  ;;  %v1711_v9 = vadd.f32 %v3328_v51, %v1710_v2 }
 0x2e2   : > { %v1549_v16 = vperm.slane %v1543_v13, %v4060_v21  ;;  %v1579_v17 = vperm.slane %v1571_v15, %v4060_v21  ;;  %v1556_v19 = vrot.slane %v1553_v12, 4  ;;  %v1781_v31 = vsel %vm1449_vm3, %v1553_v12, 0 }
 0x2e3   : > { %v1569_v18 = vsel %vm1145_vm2, %v1568_v14, %v1562_v0  ;;  %v1699_v15 = vadd.f32 %v3328_v51, %v1698_v40 }
 0x2e4   : > { %v1717_v20 = vsel %vm1449_vm3, %v1549_v16, 0  ;;  %v1575_v22 = vperm.slane %v1569_v18, %v4060_v21  ;;  %v1554_v23 = vrot.slane %v1549_v16, 4  ;;  %v1582_v25 = vrot.slane %v1579_v17, 4 }
 0x2e5   : > { %1726 = vmatpush.bf16.msrb.mxu3 %v1717_v20  ;;  %v1557_v30 = vsel %vm1145_vm2, 0, %v1556_v19  ;;  %v1797_v32 = vsel %vm1449_vm3, %v1579_v17, 0  ;;  %v1709_v17 = vadd.f32 %v3328_v51, %v1708_v53 }
 0x2e6   : > { %v1733_v26 = vsel %vm1449_vm3, %v1575_v22, 0  ;;  %v1555_v27 = vsel %vm1145_vm2, 0, %v1554_v23  ;;  %v1580_v28 = vrot.slane %v1575_v22, 4  ;;  %v1583_v34 = vsel %vm1145_vm2, 0, %v1582_v25 }
 0x2e7   : > { %1742 = vmatpush.bf16.msrb.mxu0 %v1733_v26  ;;  %v1749_v29 = vsel %vm1449_vm3, %v1555_v27, 0  ;;  %v1813_v36 = vsel %vm1449_vm3, %v1557_v30, 0  ;;  %v1829_v37 = vsel %vm1449_vm3, %v1583_v34, 0 }
 0x2e8   : > { %3008 = vmatmul.msk.bf16.vlgmr.msrb.gmra.mxu3 %vm1445_vm4, %v1412_v24  ;;  %1758 = vmatpush.bf16.msra.mxu1 %v1749_v29  ;;  %v1581_v33 = vsel %vm1145_vm2, 0, %v1580_v28 }
 0x2e9   : > { %v1765_v35 = vsel %vm1449_vm3, %v1581_v33, 0 }
 0x2ea   : > { %3009 = vmatmul.msk.bf16.vlgmr.msrb.gmra.mxu0 %vm1445_vm4, %v1412_v24  ;;  %1774 = vmatpush.bf16.msra.mxu3 %v1765_v35 }
 0x2eb   : > { %1790 = vmatpush.bf16.msra.mxu0 %v1781_v31  ;;  %3010 = vmatmul.msk.bf16.vlgmr.msra.gmra.mxu1 %vm1445_vm4, %v1412_v24 }
 0x2ec   : > { %1806 = vmatpush.bf16.msrb.mxu1 %v1797_v32 }
 0x2ee   : > { %1822 = vmatpush.bf16.msrb.mxu3 %v1813_v36 }
 0x2ef   : > { %1838 = vmatpush.bf16.msrb.mxu0 %v1829_v37 }
 0x2f8   : > { %3011 = vmatmul.msk.bf16.vlgmr.msra.gmra.mxu3 %vm1445_vm4, %v1412_v24 }
 0x2fa   : > { %3012 = vmatmul.msk.bf16.vlgmr.msra.gmra.mxu0 %vm1445_vm4, %v1412_v24 }
 0x2fb   : > { %3013 = vmatmul.msk.bf16.vlgmr.msrb.gmra.mxu1 %vm1445_vm4, %v1412_v24 }
 0x308   : > { %3014 = vmatmul.msk.bf16.vlgmr.msrb.gmra.mxu3 %vm1445_vm4, %v1412_v24 }
 0x30a   : > { %3015 = vmatmul.msk.bf16.vlgmr.msrb.gmra.mxu0 %vm1445_vm4, %v1412_v24 }
 0x367   : > { %v1744_v43 = vpop.f32.mrf.mxu0 }
 0x368   : > { %v1760_v44 = vpop.f32.mrf.mxu1  ;;  %v1745_v0 = vadd.f32 %v1744_v43, %v1696_v60 }
 0x369   : > { %v1761_v19 = vadd.f32 %v1760_v44, %v1699_v15 }
 0x36a   : > { %v1845_v7 = vpack.c.bf16 %v1745_v0, %v1745_v0 }
 0x36b   : > { %v1728_v45 = vpop.f32.mrf.mxu3  ;;  %v1846_v33 = vpack.c.bf16 %v1761_v19, %v1761_v19 }
 0x36c   : > { %v1729_v8 = vadd.f32 %v1728_v45, %v1694_v3 }
 0x36e   : > { %v1844_v16 = vpack.c.bf16 %v1729_v8, %v1729_v8 }
 0x36f   : > { %v1746_v46 = vpop.f32.mrf.mxu0 }
 0x370   : > { %v1762_v48 = vpop.f32.mrf.mxu1 }
 0x373   : > { %v1730_v49 = vpop.f32.mrf.mxu3 }
 0x377   : > { %v1792_v50 = vpop.f32.mrf.mxu0 }
 0x378   : > { %v1808_v52 = vpop.f32.mrf.mxu1  ;;  %v1793_v61 = vadd.f32 %v1792_v50, %v1704_v58 }
 0x379   : > { %v1809_v57 = vadd.f32 %v1808_v52, %v1706_v54 }
 0x37a   : > { %v1848_v4 = vpack.c.bf16 %v1793_v61, %v1793_v61 }
 0x37b   : > { %v1776_v55 = vpop.f32.mrf.mxu3  ;;  %v1849_v62 = vpack.c.bf16 %v1809_v57, %v1809_v57 }
 0x37c   : > { %v1852_v11 = vrot.slane %v1848_v4, 4  ;;  %v1777_v13 = vadd.f32 %v1776_v55, %v1701_v6 }
 0x37d   : > { %v1880_v5 = vrot.slane %v1849_v62, 4 }
 0x37e   : > { %v1853_v23 = vsel %vm1145_vm2, %v1852_v11, %v1844_v16  ;;  %v1847_v24 = vpack.c.bf16 %v1777_v13, %v1777_v13 }
 0x37f   : > { %v1794_v59 = vpop.f32.mrf.mxu0  ;;  %v1881_v12 = vsel %vm1145_vm2, %v1880_v5, %v1845_v7  ;;  %v1857_v29 = vperm.slane %v1853_v23, %v4100_v56 }
 0x380   : > { %v1810_v63 = vpop.f32.mrf.mxu1  ;;  %v1885_v20 = vperm.slane %v1881_v12, %v4100_v56 }
 0x381   : > { %v1866_v39 = vrot.slane %v1857_v29, 4 }
 0x382   : > { %v1894_v30 = vrot.slane %v1885_v20, 4 }
 0x383   : > { %v1778_v1 = vpop.f32.mrf.mxu3 }
 0x387   : > { %v1840_v10 = vpop.f32.mrf.mxu0 }
 0x388   : > { %v1841_v14 = vadd.f32 %v1840_v10, %v1711_v9 }
 0x38a   : > { %v1851_v18 = vpack.c.bf16 %v1841_v14, %v1841_v14 }
 0x38b   : > { %v1824_v22 = vpop.f32.mrf.mxu3 }
 0x38c   : > { %v1886_v25 = vrot.slane %v1851_v18, 4  ;;  %v1825_v26 = vadd.f32 %v1824_v22, %v1709_v17 }
 0x38e   : > { %v1887_v27 = vsel %vm1145_vm2, %v1886_v25, %v1847_v24  ;;  %v1850_v28 = vpack.c.bf16 %v1825_v26, %v1825_v26 }
 0x38f   : > { %v1891_v31 = vperm.slane %v1887_v27, %v4100_v56  ;;  %v1842_v32 = vpop.f32.mrf.mxu0 }
 0x390   : > { %v1858_v34 = vrot.slane %v1850_v28, 4 }
 0x391   : > { %v1892_v35 = vrot.slane %v1891_v31, 4  ;;  %v1895_v36 = vsel %vm1145_vm2, %v1891_v31, %v1894_v30 }
 0x392   : > { %v1903_v37 = vperm.slane %v1895_v36, %v4060_v21  ;;  %v1859_v38 = vsel %vm1145_vm2, %v1858_v34, %v1846_v33 }
 0x393   : > { %v1893_v40 = vsel %vm1145_vm2, %v1892_v35, %v1885_v20  ;;  %v1863_v41 = vperm.slane %v1859_v38, %v4100_v56  ;;  %v1826_v42 = vpop.f32.mrf.mxu3 }
 0x394   : > { %v1899_v43 = vperm.slane %v1893_v40, %v4060_v21  ;;  %v1906_v44 = vrot.slane %v1903_v37, 4  ;;  %v1924_v55 = vshrl.u32 %v1903_v37, 16 }
 0x395   : > { %v1864_v45 = vrot.slane %v1863_v41, 4  ;;  %v1867_v46 = vsel %vm1145_vm2, %v1863_v41, %v1866_v39 }
 0x396   : > { %v1904_v47 = vrot.slane %v1899_v43, 4  ;;  %v1875_v48 = vperm.slane %v1867_v46, %v4060_v21  ;;  %v1907_v50 = vsel %vm1145_vm2, 0, %v1906_v44  ;;  %v1912_v54 = vshrl.u32 %v1899_v43, 16 }
 0x397   : > { %v1865_v49 = vsel %vm1145_vm2, %v1864_v45, %v1857_v29  ;;  %v1930_v62 = vshrl.u32 %v1907_v50, 16 }
 0x398   : > { %v1871_v51 = vperm.slane %v1865_v49, %v4060_v21  ;;  %v1878_v52 = vrot.slane %v1875_v48, 4  ;;  %v1922_v53 = vpack.i.b16 %v1903_v37, %v1875_v48  ;;  %v1905_v56 = vsel %vm1145_vm2, 0, %v1904_v47 }
 0x399   : > { %v1923_v57 = vshrl.u32 %v1875_v48, 16  ;;  %v1918_v2 = vshrl.u32 %v1905_v56, 16 }
 0x39a   : > { %v1876_v58 = vrot.slane %v1871_v51, 4  ;;  %v1879_v59 = vsel %vm1145_vm2, 0, %v1878_v52  ;;  %v1910_v60 = vpack.i.b16 %v1899_v43, %v1871_v51  ;;  %v1911_v61 = vshrl.u32 %v1871_v51, 16 }
 0x39b   : > { %v1925_v63 = vpack.i.b16 %v1924_v55, %v1923_v57  ;;  %v1928_v0 = vpack.i.b16 %v1907_v50, %v1879_v59  ;;  %v1929_v1 = vshrl.u32 %v1879_v59, 16  ;;  %v1936_v4 = vunpack.c.l.b16 %v1922_v53 }
 0x39c   : > { %v1877_v3 = vsel %vm1145_vm2, 0, %v1876_v58  ;;  %v1913_v21 = vpack.i.b16 %v1912_v54, %v1911_v61  ;;  %v1932_v9 = vunpack.c.l.b16 %v1910_v60 }
 0x39d   : > { %v1916_v5 = vpack.i.b16 %v1905_v56, %v1877_v3  ;;  %v1917_v6 = vshrl.u32 %v1877_v3, 16  ;;  %v1931_v7 = vpack.i.b16 %v1930_v62, %v1929_v1  ;;  %v1937_v8 = vunpack.c.l.b16 %v1925_v63 }
 0x39e   : > { %v1933_v10 = vunpack.c.l.b16 %v1913_v21  ;;  %v1938_v12 = vunpack.c.l.b16 %v1928_v0 }
 0x39f   : > { %v1919_v11 = vpack.i.b16 %v1918_v2, %v1917_v6  ;;  %v1939_v13 = vunpack.c.l.b16 %v1931_v7  ;;  %v1942_v14 = vpack.c.b16 %v1937_v8, %v1936_v4  ;;  %v1934_v16 = vunpack.c.l.b16 %v1916_v5 }
 0x3a0   : > { %v1940_v15 = vpack.c.b16 %v1933_v10, %v1932_v9 }
 0x3a1   : > { %v1935_v17 = vunpack.c.l.b16 %v1919_v11  ;;  %v1943_v18 = vpack.c.b16 %v1939_v13, %v1938_v12  ;;  %1950 = vst [vmem:[#allocation2 + $0x18] sm:$0xff] %v1942_v14 }
 0x3a2   : > { %1948 = vst [vmem:[#allocation2 + $0x10] sm:$0xff] %v1940_v15 }
 0x3a3   : > { %v1941_v19 = vpack.c.b16 %v1935_v17, %v1934_v16  ;;  %1951 = vst [vmem:[#allocation2 + $0x8] sm:$0xff] %v1943_v18 }
 0x3a5   : > { %1949 = vst [vmem:[#allocation2] sm:$0xff] %v1941_v19 }
 0x3a6 PF: > { %vm1981_vm5 = vcmask 1043456   ;;  %v1952_v45 = vld [vmem:[%s3896_s9] sm:$0xf]  ;;  %vm1977_vm6 = vcmask 64512   ;;  %v3177_v51 = vld [vmem:[#allocation9 + $0x10] sm:$0xff]  ;;  %v3176_v52 = vld [vmem:[#allocation9 + $0x8] sm:$0xff] }
 0x3a7   : > { %v3178_v50 = vld [vmem:[#allocation9 + $0x18] sm:$0xff]  ;;  %v3175_v53 = vld [vmem:[#allocation9] sm:$0xff]  ;;  %vm2301_vm7 = vcmask 523264   ;;  %v3173_v55 = vld [vmem:[%s3890_s6 + $0x30] sm:$0xff]  ;;  %v3594_v9 = vmov 1983009808  }
 0x3a8   : > { %v1955_v28 = vld [vmem:[#allocation2 + $0x18] sm:$0xff]  ;;  %v3172_v56 = vld [vmem:[%s3890_s6 + $0x28] sm:$0xff]  ;;  %v3174_v61 = vld [vmem:[%s3890_s6 + $0x38] sm:$0xff]  ;;  %v2130_v10 = vunpack.c.l.s4 %v3594_v9  ;;  %vm2127_vm8 = vcmask 1047556   ;;  %s4410_s12 = sld [smem:[#allocation42_spill]]  ;;  %s3097_s25 = sshll.u32 %s3572_s20, 5 }
 0x3a9   : > { %v1953_v20 = vld [vmem:[#allocation2 + $0x10] sm:$0xff]  ;;  %v1965_v31 = vunpack.c.l.b16 %v1955_v28  ;;  %v1966_v32 = vunpack.c.h.b16 %v1955_v28  ;;  %v3167_v54 = vld [vmem:[%s3890_s6] sm:$0xff]  ;;  %v3168_v60 = vld [vmem:[%s3890_s6 + $0x8] sm:$0xff]  ;;  %s4411_s13 = sld [smem:[#allocation36_spill]]  ;;  %s2548_s27 = sadd.s32 %s3097_s25, %s3876_s26 }
 0x3aa   : > { %v1961_v23 = vunpack.c.l.b16 %v1953_v20  ;;  %v1962_v24 = vunpack.c.h.b16 %v1953_v20  ;;  %v1956_v27 = vld [vmem:[#allocation2 + $0x8] sm:$0xff]  ;;  %v3171_v57 = vld [vmem:[%s3890_s6 + $0x20] sm:$0xff]  ;;  %v2131_v15 = vunpack.c.0.s8 %v2130_v10  ;;  %v3595_v20 = vmov 1934713408   ;;  %s3098_s15 = sshll.u32 %s2548_s27, 3  ;;  %s4412_s1 = sld [smem:[#allocation43_spill]] }
 0x3ab   : > { %v1967_v29 = vunpack.c.l.b16 %v1956_v27  ;;  %v1968_v30 = vunpack.c.h.b16 %v1956_v27  ;;  %v1973_v39 = vpack.c.b16 %v1965_v31, %v1965_v31  ;;  %v1974_v40 = vpack.c.b16 %v1966_v32, %v1966_v32  ;;  %v3169_v4 = vld [vmem:[%s3890_s6 + $0x10] sm:$0xff]  ;;  %s2551_s26 = sshll.u32 %s3898_s30, 4  ;;  %s4415_s8 = sand.u32 1, %s3548_s28   ;;  %s2552_s26 = int_to_ptr.vmem [resolvable:$true] %s2551_s26 }
 0x3ac   : > { %v1954_v22 = vld [vmem:[#allocation2] sm:$0xff]  ;;  %v1969_v33 = vpack.c.b16 %v1961_v23, %v1961_v23  ;;  %v1970_v34 = vpack.c.b16 %v1962_v24, %v1962_v24  ;;  %s2536_s11 = scalar_lea.sflag [#allocation5], %s4415_s8 }
 0x3ad   : > { %v1963_v25 = vunpack.c.l.b16 %v1954_v22  ;;  %v1964_v26 = vunpack.c.h.b16 %v1954_v22  ;;  %v1975_v37 = vpack.c.b16 %v1967_v29, %v1967_v29  ;;  %v1976_v38 = vpack.c.b16 %v1968_v30, %v1968_v30 }
 0x3ae   : > { %v1983_v41 = vsel %vm1981_vm5, %v1969_v33, 0  ;;  %v1986_v42 = vsel %vm1981_vm5, %v1970_v34, 0  ;;  %v1995_v48 = vsel %vm1981_vm5, %v1973_v39, 0  ;;  %v1998_v49 = vsel %vm1981_vm5, %v1974_v40, 0 }
 0x3af   : > { %v1971_v35 = vpack.c.b16 %v1963_v25, %v1963_v25  ;;  %v1972_v36 = vpack.c.b16 %v1964_v26, %v1964_v26  ;;  %2013 = vmatpush.bf16.msra.mxu0 %v1983_v41  ;;  %2026 = vmatpush.bf16.msra.mxu1 %v1986_v42  ;;  %v2001_v46 = vsel %vm1981_vm5, %v1975_v37, 0  ;;  %v2004_v47 = vsel %vm1981_vm5, %v1976_v38, 0  ;;  %v3170_v25 = vld [vmem:[%s3890_s6 + $0x18] sm:$0xff] }
 0x3b0   : > { %2104 = vmatpush.bf16.msra.mxu3 %v2004_v47  ;;  %v2144_v22 = vunpack.c.l.s4 %v3595_v20  ;;  %s4413_s24 = smov %s4412_s1  ;;  %s2550_s21 = scalar_lea.hbm %s4412_s1, %s3098_s15 }
 0x3b1   : > { %v1989_v43 = vsel %vm1981_vm5, %v1971_v35, 0  ;;  %v1992_v44 = vsel %vm1981_vm5, %v1972_v36, 0  ;;  %s2553_s19 = sshll.u32 %s2550_s21, 4  ;;  %s3470_s6 = scalar_lea.hbm %s4413_s24, 512  ;;  %s2554_s19 = int_to_ptr.hbm [resolvable:$true] %s2553_s19 }
 0x3b2   : > { %2039 = vmatpush.bf16.msra.mxu2 %v1989_v43  ;;  %3016 = vmatmul.msk.bf16.vlgmr.msra.gmra.mxu0 %vm1977_vm6, %v1952_v45  ;;  %v2145_v31 = vunpack.c.0.s8 %v2144_v22  ;;  %s3464_s7 = sshra.s32 %s2554_s19, 4  ;;  %s3465_s7 = int_to_ptr.hbm [resolvable:$true] %s3464_s7 }
 0x3b3   : > { %2052 = vmatpush.bf16.msrb.mxu1 %v1992_v44  ;;  %2065 = vmatpush.bf16.msrb.mxu0 %v1995_v48  ;;  %s3466_s5 = scalar_lea.hbm %s3465_s7, 128  ;;  %p3471_p6 = scmp.lt.s32.totalorder %s3465_s7, %s4413_s24 }
 0x3b4   : > { %3017 = vmatmul.msk.bf16.vlgmr.msra.gmra.mxu1 %vm1977_vm6, %v1952_v45  ;;  %3023 = vmatmul.msk.bf16.vlgmr.msra.gmra.mxu3 %vm1977_vm6, %v1952_v45  ;;  %p3467_p2 = scmp.ne.s32.totalorder %s3465_s7, %s3466_s5  ;;  %p3472_p8 = scmp.lt.s32.totalorder %s3470_s6, %s3466_s5 }
 0x3b5   : > { %3018 = vmatmul.msk.bf16.vlgmr.msra.gmra.mxu2 %vm1977_vm6, %v1952_v45  ;;  %3181 = vmatpush.bf16.msrb.mxu3 %v3178_v50 }
 0x3b6   : > { %2091 = vmatpush.bf16.msrb.mxu2 %v2001_v46  ;;  %p3468_p4 = pnand %p3467_p2, %p3764_p7  ;;  %p3473_p10 = por %p3472_p8, %p3471_p6 }
 0x3b7   : > { %2078 = vmatpush.bf16.msra.mxu1 %v1998_v49  ;;  %2330 = vmatpush.bf16.msra.mxu0 %v3178_v50 }
 0x3b8   : > { %p3469_p5 = pneg %p3468_p4 }
 0x3b9   : > { %3183 = vmatpush.bf16.msrb.mxu3 %v3177_v51 }
 0x3ba   : > { %3180 = vmatpush.bf16.msra.mxu2 %v3178_v50  ;;  %p3474_p12 = pnand %p3473_p10, %p3469_p5 }
 0x3bb   : > { %2331 = vmatpush.bf16.msra.mxu0 %v3177_v51 }
 0x3bd   : > { %3185 = vmatpush.bf16.msrb.mxu3 %v3176_v52 }
 0x3be   : > { %3182 = vmatpush.bf16.msra.mxu2 %v3177_v51 }
 0x3bf   : > { %2332 = vmatpush.bf16.msra.mxu0 %v3176_v52 }
 0x3c1   : > { %3187 = vmatpush.bf16.msrb.mxu3 %v3175_v53 }
 0x3c2   : > { %3184 = vmatpush.bf16.msra.mxu2 %v3176_v52  ;;  %3020 = vmatmul.msk.bf16.vlgmr.msrb.gmra.mxu0 %vm1977_vm6, %v1952_v45 }
 0x3c3   : > { %2333 = vmatpush.bf16.msra.mxu0 %v3175_v53 }
 0x3c4   : > { %3019 = vmatmul.msk.bf16.vlgmr.msrb.gmra.mxu1 %vm1977_vm6, %v1952_v45  ;;  %3079 = vmatmul.msk.bf16.vlgmr.msrb.gmra.mxu3 %vm2301_vm7, %v3172_v56 }
 0x3c5   : > { %3022 = vmatmul.msk.bf16.vlgmr.msrb.gmra.mxu2 %vm1977_vm6, %v1952_v45 }
 0x3c6   : > { %3186 = vmatpush.bf16.msra.mxu2 %v3175_v53 }
 0x3d2   : > { %3074 = vmatmul.msk.bf16.vlgmr.msra.gmra.mxu0 %vm2301_vm7, %v3167_v54 }
 0x3d4   : > { %3021 = vmatmul.msk.bf16.vlgmr.msra.gmra.mxu1 %vm1977_vm6, %v1952_v45  ;;  %3080 = vmatmul.msk.bf16.gmra.mxu3 %vm2301_vm7, %v3173_v55 }
 0x3d5   : > { %3078 = vmatmul.msk.bf16.vlgmr.msra.gmra.mxu2 %vm2301_vm7, %v3171_v57 }
 0x3e2   : > { %3075 = vmatmul.msk.bf16.gmra.mxu0 %vm2301_vm7, %v3168_v60 }
 0x3e4   : > { %3081 = vmatmul.msk.bf16.gmra.mxu3 %vm2301_vm7, %v3174_v61 }
 0x3f2   : > { %3076 = vmatmul.msk.bf16.gmra.mxu0 %vm2301_vm7, %v3169_v4 }
 0x402   : > { %3077 = vmatmul.msk.bf16.gmra.mxu0 %vm2301_vm7, %v3170_v25 }
 0x42f   : > { %v2015_v58 = vpop.f32.mrf.mxu0 }
 0x431   : > { %v2028_v59 = vpop.f32.mrf.mxu1 }
 0x432   : > { %v2110_v16 = vpack.c.bf16 %v2028_v59, %v2015_v58  ;;  %v3166_v58 = vld [vmem:[%s4410_s12] sm:$0xff] }
 0x434   : > { %v2115_v26 = vrot.slane %v2110_v16, 4 }
 0x437   : > { %v2017_v0 = vpop.f32.mrf.mxu0  ;;  %v2106_v1 = vpop.f32.mrf.mxu3 }
 0x438   : > { %v2041_v62 = vpop.f32.mrf.mxu2 }
 0x439   : > { %v2030_v63 = vpop.f32.mrf.mxu1 }
 0x43f   : > { %v2067_v21 = vpop.f32.mrf.mxu0  ;;  %v2108_v5 = vpop.f32.mrf.mxu3 }
 0x440   : > { %v2043_v2 = vpop.f32.mrf.mxu2 }
 0x441   : > { %v2054_v3 = vpop.f32.mrf.mxu1 }
 0x442   : > { %v2111_v6 = vpack.c.bf16 %v2054_v3, %v2041_v62 }
 0x444   : > { %v2118_v13 = vrot.slane %v2111_v6, 4 }
 0x447   : > { %v2069_v12 = vpop.f32.mrf.mxu0 }
 0x448   : > { %v2093_v7 = vpop.f32.mrf.mxu2 }
 0x449   : > { %v2113_v8 = vpack.c.bf16 %v2106_v1, %v2093_v7  ;;  %v2056_v11 = vpop.f32.mrf.mxu1 }
 0x44b   : > { %v2133_v14 = vrot.slane %v2113_v8, 4  ;;  %v2162_v17 = vsel %vm2127_vm8, %v2113_v8, %v2118_v13 }
 0x44c   : > { %v2166_v23 = vperm.slane %v2162_v17, %v2131_v15  ;;  %v2360_v17 = vpop.f32.mrf.mxu3 }
 0x44d   : > { %v2134_v18 = vsel %vm2127_vm8, %v2133_v14, %v2111_v6 }
 0x44e   : > { %v2138_v28 = vperm.slane %v2134_v18, %v2131_v15  ;;  %v2167_v32 = vrot.slane %v2166_v23, 4 }
 0x450   : > { %v2095_v19 = vpop.f32.mrf.mxu2  ;;  %v2139_v35 = vrot.slane %v2138_v28, 4 }
 0x451   : > { %v2080_v24 = vpop.f32.mrf.mxu1 }
 0x452   : > { %v2112_v27 = vpack.c.bf16 %v2080_v24, %v2067_v21 }
 0x454   : > { %v2126_v29 = vrot.slane %v2112_v27, 4  ;;  %v2156_v30 = vsel %vm2127_vm8, %v2112_v27, %v2115_v26  ;;  %v2362_v19 = vpop.f32.mrf.mxu3 }
 0x455   : > { %v2160_v33 = vperm.slane %v2156_v30, %v2131_v15 }
 0x456   : > { %v2128_v34 = vsel %vm2127_vm8, %v2126_v29, %v2110_v16  ;;  %v2335_v16 = vpop.f32.mrf.mxu0 }
 0x457   : > { %v2132_v36 = vperm.slane %v2128_v34, %v2131_v15  ;;  %v2168_v37 = vsel %vm2127_vm8, %v2167_v32, %v2160_v33  ;;  %v2169_v38 = vrot.slane %v2160_v33, 4 }
 0x458   : > { %v2174_v39 = vperm.slane %v2168_v37, %v2145_v31  ;;  %v2355_v27 = vpop.f32.mrf.mxu2 }
 0x459   : > { %v2141_v40 = vrot.slane %v2132_v36, 4  ;;  %v2082_v41 = vpop.f32.mrf.mxu1  ;;  %v2140_v42 = vsel %vm2127_vm8, %v2139_v35, %v2132_v36  ;;  %v2170_v43 = vsel %vm2127_vm8, %v2166_v23, %v2169_v38 }
 0x45a   : > { %v2146_v44 = vperm.slane %v2140_v42, %v2145_v31  ;;  %v2179_v45 = vrot.slane %v2174_v39, 4  ;;  %v2178_v46 = vperm.slane %v2170_v43, %v2145_v31  ;;  %v2187_v47 = vshrl.u32 %v2174_v39, 16 }
 0x45b   : > { %v2142_v48 = vsel %vm2127_vm8, %v2138_v28, %v2141_v40  ;;  %v4232_v28 = vld [vmem:[%s4411_s13] ss:$0 sm:$0xff] }
 0x45c   : > { %v2185_v49 = vpack.i.b16 %v2174_v39, %v2146_v44  ;;  %v2186_v50 = vshrl.u32 %v2146_v44, 16  ;;  %v2151_v51 = vrot.slane %v2146_v44, 4  ;;  %v2180_v52 = vsel %vm2127_vm8, 0, %v2179_v45  ;;  %v2365_v22 = vpop.f32.mrf.mxu3 }
 0x45d   : > { %v2150_v53 = vperm.slane %v2142_v48, %v2145_v31  ;;  %v2199_v56 = vshrl.u32 %v2178_v46, 16  ;;  %v2181_v54 = vrot.slane %v2178_v46, 4  ;;  %v2193_v60 = vshrl.u32 %v2180_v52, 16 }
 0x45e   : > { %v2384_v55 = vsel %vm1981_vm5, %v2185_v49, 0  ;;  %v2188_v57 = vpack.i.b16 %v2187_v47, %v2186_v50  ;;  %v2152_v59 = vsel %vm2127_vm8, 0, %v2151_v51  ;;  %v2337_v18 = vpop.f32.mrf.mxu0  ;;  %v2336_v30 = vadd.f32 %v4232_v28, %v2335_v16 }
 0x45f   : > { %2393 = vmatpush.bf16.msrb.mxu1 %v2384_v55  ;;  %v2191_v61 = vpack.i.b16 %v2180_v52, %v2152_v59  ;;  %v2197_v62 = vpack.i.b16 %v2178_v46, %v2150_v53  ;;  %v2198_v63 = vshrl.u32 %v2150_v53, 16  ;;  %v2192_v0 = vshrl.u32 %v2152_v59, 16 }
 0x460   : > { %v2401_v1 = vsel %vm1981_vm5, %v2188_v57, 0  ;;  %v2153_v2 = vrot.slane %v2150_v53, 4  ;;  %v2182_v3 = vsel %vm2127_vm8, 0, %v2181_v54  ;;  %v2357_v32 = vpop.f32.mrf.mxu2  ;;  %v2338_v37 = vadd.f32 %v4232_v28, %v2337_v18 }
 0x461   : > { %2410 = vmatpush.bf16.msrb.mxu2 %v2401_v1  ;;  %v2418_v21 = vsel %vm1981_vm5, %v2191_v61, 0  ;;  %v2452_v4 = vsel %vm1981_vm5, %v2197_v62, 0  ;;  %v2200_v5 = vpack.i.b16 %v2199_v56, %v2198_v63  ;;  %v2194_v6 = vpack.i.b16 %v2193_v60, %v2192_v0 }
 0x462   : > { %3086 = vmatmul.msk.bf16.vlgmr.msrb.gmra.mxu1 %vm1977_vm6, %v3166_v58  ;;  %2427 = vmatpush.bf16.msra.mxu3 %v2418_v21  ;;  %v2154_v7 = vsel %vm2127_vm8, 0, %v2153_v2  ;;  %v2205_v8 = vshrl.u32 %v2182_v3, 16  ;;  %v2356_v55 = vadd.f32 %v4232_v28, %v2355_v27  ;;  %v2361_v57 = vadd.f32 %v4232_v28, %v2360_v17 }
 0x463   : > { %v2469_v9 = vsel %vm1981_vm5, %v2200_v5, 0  ;;  %v2435_v10 = vsel %vm1981_vm5, %v2194_v6, 0  ;;  %v2203_v11 = vpack.i.b16 %v2182_v3, %v2154_v7  ;;  %v2204_v12 = vshrl.u32 %v2154_v7, 16 }
 0x464   : > { %3087 = vmatmul.msk.bf16.vlgmr.msrb.gmra.mxu2 %vm1977_vm6, %v3166_v58  ;;  %2444 = vmatpush.bf16.msra.mxu1 %v2435_v10  ;;  %v4225_v24 = vpop.f32.mrf.mxu3  ;;  %v2366_v0 = vadd.f32 %v4232_v28, %v2365_v22  ;;  %v2358_v1 = vadd.f32 %v4232_v28, %v2357_v32  ;;  %v2363_v2 = vadd.f32 %v4232_v28, %v2362_v19 }
 0x465   : > { %2461 = vmatpush.bf16.msra.mxu2 %v2452_v4  ;;  %3088 = vmatmul.msk.bf16.vlgmr.msra.gmra.mxu3 %vm1977_vm6, %v3166_v58  ;;  %v2486_v13 = vsel %vm1981_vm5, %v2203_v11, 0  ;;  %v2206_v14 = vpack.i.b16 %v2205_v8, %v2204_v12  ;;  %v2368_v8 = vadd.f32 %v4232_v28, %v4225_v24 }
 0x466   : > { %2478 = vmatpush.bf16.msrb.mxu3 %v2469_v9  ;;  %v2340_v20 = vpop.f32.mrf.mxu0 }
 0x467   : > { %v2503_v15 = vsel %vm1981_vm5, %v2206_v14, 0  ;;  %v2341_v35 = vadd.f32 %v4232_v28, %v2340_v20 }
 0x468   : > { %2495 = vmatpush.bf16.msrb.mxu1 %v2486_v13 }
 0x469   : > { %2512 = vmatpush.bf16.msrb.mxu2 %v2503_v15 }
 0x46c   : > { %v4227_v26 = vpop.f32.mrf.mxu3 }
 0x46d   : > { %v2371_v9 = vadd.f32 %v4232_v28, %v4227_v26 }
 0x46e   : > { %v2342_v23 = vpop.f32.mrf.mxu0 }
 0x46f   : > { %v2343_v47 = vadd.f32 %v4232_v28, %v2342_v23 }
 0x472   : > { %3089 = vmatmul.msk.bf16.vlgmr.msra.gmra.mxu1 %vm1977_vm6, %v3166_v58 }
 0x474   : > { %3090 = vmatmul.msk.bf16.vlgmr.msra.gmra.mxu2 %vm1977_vm6, %v3166_v58  ;;  %v4235_v31 = vpop.f32.mrf.mxu3 }
 0x475   : > { %3091 = vmatmul.msk.bf16.vlgmr.msrb.gmra.mxu3 %vm1977_vm6, %v3166_v58  ;;  %v2373_v14 = vadd.f32 %v4232_v28, %v4235_v31 }
 0x476   : > { %v2345_v25 = vpop.f32.mrf.mxu0 }
 0x477   : > { %v2346_v36 = vadd.f32 %v4232_v28, %v2345_v25 }
 0x47e   : > { %v2347_v29 = vpop.f32.mrf.mxu0 }
 0x47f   : > { %v2348_v46 = vadd.f32 %v4232_v28, %v2347_v29 }
 0x482   : > { %3092 = vmatmul.msk.bf16.vlgmr.msrb.gmra.mxu1 %vm1977_vm6, %v3166_v58 }
 0x484   : > { %3093 = vmatmul.msk.bf16.vlgmr.msrb.gmra.mxu2 %vm1977_vm6, %v3166_v58 }
 0x486   : > { %v2350_v38 = vpop.f32.mrf.mxu0 }
 0x487   : > { %v2351_v45 = vadd.f32 %v4232_v28, %v2350_v38 }
 0x48e   : > { %v2352_v56 = vpop.f32.mrf.mxu0 }
 0x48f   : > { %v2353_v54 = vadd.f32 %v4232_v28, %v2352_v56 }
 0x4df   : > { %v2395_v33 = vpop.f32.mrf.mxu1 }
 0x4e0   : > { %v2396_v34 = vadd.f32 %v2395_v33, %v2336_v30 }
 0x4e2   : > { %2519 = vst [vmem:[%s3898_s30] sm:$0xff] %v2396_v34 }
 0x4e7   : > { %v2397_v39 = vpop.f32.mrf.mxu1  ;;  %v2412_v40 = vpop.f32.mrf.mxu2 }
 0x4e8   : > { %v2398_v41 = vadd.f32 %v2397_v39, %v2338_v37  ;;  %v2429_v42 = vpop.f32.mrf.mxu3  ;;  %v2413_v43 = vadd.f32 %v2412_v40, %v2341_v35 }
 0x4e9   : > { %v2430_v44 = vadd.f32 %v2429_v42, %v2346_v36 }
 0x4ea   : > { %2520 = vst [vmem:[%s3898_s30 + $0x8] sm:$0xff] %v2398_v41 }
 0x4eb   : > { %2521 = vst [vmem:[%s3898_s30 + $0x10] sm:$0xff] %v2413_v43 }
 0x4ec   : > { %2523 = vst [vmem:[%s3898_s30 + $0x20] sm:$0xff] %v2430_v44 }
 0x4ef   : > { %v2414_v48 = vpop.f32.mrf.mxu2  ;;  %v2446_v49 = vpop.f32.mrf.mxu1 }
 0x4f0   : > { %v2431_v50 = vpop.f32.mrf.mxu3  ;;  %v2415_v51 = vadd.f32 %v2414_v48, %v2343_v47  ;;  %v2447_v52 = vadd.f32 %v2446_v49, %v2351_v45 }
 0x4f1   : > { %v2432_v53 = vadd.f32 %v2431_v50, %v2348_v46 }
 0x4f2   : > { %2522 = vst [vmem:[%s3898_s30 + $0x18] sm:$0xff] %v2415_v51 }
 0x4f3   : > { %2524 = vst [vmem:[%s3898_s30 + $0x28] sm:$0xff] %v2432_v53 }
 0x4f4   : > { %2525 = vst [vmem:[%s3898_s30 + $0x30] sm:$0xff] %v2447_v52 }
 0x4f7   : > { %v2448_v58 = vpop.f32.mrf.mxu1  ;;  %v2463_v59 = vpop.f32.mrf.mxu2 }
 0x4f8   : > { %v2464_v60 = vadd.f32 %v2463_v59, %v2356_v55  ;;  %v2480_v61 = vpop.f32.mrf.mxu3  ;;  %v2449_v62 = vadd.f32 %v2448_v58, %v2353_v54 }
 0x4f9   : > { %v2481_v63 = vadd.f32 %v2480_v61, %v2361_v57 }
 0x4fa   : > { %2527 = vst [vmem:[%s3898_s30 + $0x40] sm:$0xff] %v2464_v60 }
 0x4fb   : > { %2529 = vst [vmem:[%s3898_s30 + $0x50] sm:$0xff] %v2481_v63 }
 0x4fc   : > { %2526 = vst [vmem:[%s3898_s30 + $0x38] sm:$0xff] %v2449_v62 }
 0x4ff   : > { %v2465_v3 = vpop.f32.mrf.mxu2  ;;  %v2497_v21 = vpop.f32.mrf.mxu1 }
 0x500   : > { %v2466_v4 = vadd.f32 %v2465_v3, %v2358_v1  ;;  %v2498_v5 = vadd.f32 %v2497_v21, %v2366_v0  ;;  %v2482_v6 = vpop.f32.mrf.mxu3 }
 0x501   : > { %v2483_v7 = vadd.f32 %v2482_v6, %v2363_v2 }
 0x502   : > { %2528 = vst [vmem:[%s3898_s30 + $0x48] sm:$0xff] %v2466_v4 }
 0x503   : > { %2531 = vst [vmem:[%s3898_s30 + $0x60] sm:$0xff] %v2498_v5 }
 0x504   : > { %2530 = vst [vmem:[%s3898_s30 + $0x58] sm:$0xff] %v2483_v7 }
 0x507   : > { %v2499_v10 = vpop.f32.mrf.mxu1  ;;  %v2514_v11 = vpop.f32.mrf.mxu2 }
 0x508   : > { %v2500_v12 = vadd.f32 %v2499_v10, %v2368_v8  ;;  %v2515_v13 = vadd.f32 %v2514_v11, %v2371_v9 }
 0x50a   : > { %2532 = vst [vmem:[%s3898_s30 + $0x68] sm:$0xff] %v2500_v12 }
 0x50b   : > { %2533 = vst [vmem:[%s3898_s30 + $0x70] sm:$0xff] %v2515_v13 }
 0x50f   : > { %v2516_v15 = vpop.f32.mrf.mxu2 }
 0x510   : > { %v2517_v16 = vadd.f32 %v2516_v15, %v2373_v14 }
 0x512   : > { %2534 = vst [vmem:[%s3898_s30 + $0x78] sm:$0xff] %v2517_v16 }
 0x513   : > { %3477 = shalt.err (!%p3474_p12)
}
 0x514   : > { %s3596_s30 = smov 128   ;;  %s3597_s4 = smov 8  }
 0x515   : > { %3200 = dma.vmem_to_hbm [thread:$0]  (%p3764_p7), %s2552_s26, 2048, %s2554_s19, %s2536_s11, %s3596_s30, %s3596_s30, %s3597_s4  }
 0x516 PF: > { %s4416_s13 = sld [smem:[#allocation17_spill]]  ;;  %p3225_p13 = scmp.ge.s32.totalorder %s3584_s2, 2 }
 0x518   : > { %p3217_p3 = pnand %p3225_p13, %p3769_p9 }
 0x51a   : > { %p3218_p11 = pneg %p3217_p3 }
 0x51c   : > { %s2568_s27 = sand.u32 1, %s4416_s13  }
 0x51d   : > { %s2569_s15 = scalar_lea.sflag [#allocation5], %s2568_s27 }
 0x51e   : > { %3539 = dma.done.wait (%p3218_p11), %s2569_s15, 2048  }
 0x51f   : > { %3541 = vsyncadd (%p3218_p11), %s2569_s15, 4294965248  ;;  %s38_s2 = sadd.s32 1, %s3584_s2   ;;  %s4418_s20 = sld [smem:[#allocation25_spill]] }
 0x520   : > { %p35_p1 = scmp.ge.s32.totalorder %s38_s2, 6   ;;  %s4419_s17 = sld [smem:[#allocation18_spill]] }
 0x521   : > { %s4420_s19 = sld [smem:[#allocation24_spill]]  ;;  %s4424_s27 = smov %s3548_s28 }
 0x522   : > { %s4421_s1 = sld [smem:[#allocation19_spill]]  ;;  %s4425_s28 = smov %s3552_s29 }
 0x523   : > { %s4422_s21 = sld [smem:[#allocation22_spill]]  ;;  %s4427_s30 = smov %s3560_s0 }
 0x524   : > { %s4423_s16 = sld [smem:[#allocation23_spill]] }
 0x525   : > { %s4426_s29 = smov %s4418_s20  ;;  %s4429_s20 = smov %s3580_s22 }
 0x526   : > { %s4428_s0 = smov %s4419_s17  ;;  %37 = sbr.rel (!%p35_p1) target bundleno = 31 (0x1f), region = 171 }
 0x52a   : > { %s4430_s22 = smov %s4423_s16 }
 0x52b   :  { %2575 = vsyncpa [#allocation4], 1 }
 0x52c   :  { %2577 = vsyncpa [#allocation4 + $0x1], 1 }
 0x52d   :  { %2578 = vsyncpa [#allocation7], 1 }
 0x52e   :  { %2580 = vsyncpa [#allocation7 + $0x1], 1 }
 0x52f   :  { %2581 = vsyncpa [#allocation10], 1 }
 0x530   :  { %2582 = vsyncpa [#allocation5], 1 }
 0x531   :  { %2584 = vsyncpa [#allocation5 + $0x1], 1 }

</bundles_post_ra>
